<compile_context>
chip_gen: v6e
topology: v6e:2x2x1
jax: 0.10.0
libtpu: 0.0.40
codegen_flags: <defaults>
</compile_context>

<pallas_src>
import jax
import jax.numpy as jnp
from jax.experimental import pallas as pl
from jax.experimental.pallas import tpu as pltpu

BN_EPS = 1e-5


def _round_up(a, b):
    return (a + b - 1) // b * b


# ----------------------------------------------------------------------------
# Fused kernel: TN batch samples per grid step.
# ----------------------------------------------------------------------------
def aux_head_kernel(x_ref, w1_ref, s1_ref, b1_ref, w2_ref, s2_ref, b2_ref,
                    w3_ref, b3_ref, o_ref):
    tn = x_ref.shape[0]
    f32 = jnp.float32
    bf16 = jnp.bfloat16

    x = x_ref[...]                                            # (TN, 8, 8, C) bf16

    # 1) ReLU + AvgPool2d(5, stride=3, pad=0), separable:
    #    H pass (leading dim) = full-tile VALU adds; W pass = 4 small sublane-window sums.
    def hrow(h):                                              # ReLU'd row h: (TN, 8, C) f32
        return jnp.maximum(x[:, h].astype(f32), 0.0)

    mid = hrow(3) + hrow(4)                                   # rows shared by both H windows
    rs0 = hrow(0) + hrow(1) + hrow(2) + mid                   # H window i=0: rows 0..4
    rs1 = mid + hrow(5) + hrow(6) + hrow(7)                   # H window i=1: rows 3..7

    def wpool(rs, j):                                         # W window j: cols 3j..3j+4
        return jnp.sum(rs[:, 3 * j:3 * j + 5, :], axis=1)     # (TN, C)

    # Tap-major pooled map, tap k = i*2 + j (== conv2's kh*2+kw): (4*TN, C)
    pooled = jnp.concatenate(
        [wpool(rs0, 0), wpool(rs0, 1), wpool(rs1, 0), wpool(rs1, 1)], axis=0)
    pooled = (pooled * (1.0 / 25.0)).astype(bf16)

    # 2) Conv2d(C, 128, 1, bias=False) == one (4*TN, C) x (C, 128) matmul, + folded BN + ReLU.
    h1 = jnp.dot(pooled, w1_ref[...], preferred_element_type=f32)          # (4*TN, 128)
    h1 = jnp.maximum(h1 * s1_ref[...] + b1_ref[...], 0.0).astype(bf16)

    # 3) Conv2d(128, 768, 2, bias=False) on the 2x2 map: 4 taps, each a contiguous
    #    (TN, 128) slice of tap-major h1 against w2[k]; f32 accumulation; + BN + ReLU.
    w2 = w2_ref[...]                                                       # (4, 128, 768)
    acc = jnp.dot(h1[0:tn], w2[0], preferred_element_type=f32)
    for k in range(1, 4):
        acc = acc + jnp.dot(h1[k * tn:(k + 1) * tn], w2[k], preferred_element_type=f32)
    h2 = jnp.maximum(acc * s2_ref[...] + b2_ref[...], 0.0).astype(bf16)    # (TN, 768)

    # 4) Linear classifier (padded to 128 lanes; wrapper slices back to num_classes).
    o_ref[...] = jnp.dot(h2, w3_ref[...], preferred_element_type=f32) + b3_ref[...]


# ----------------------------------------------------------------------------
# Wrapper (NHWC-native; no transpose on the perf path).
# ----------------------------------------------------------------------------
def aux_head_cifar(x_nhwc, params, *, tn=128):
    """Fused AuxiliaryHeadCIFAR forward.  x_nhwc: (N, 8, 8, C), any float dtype.

    tn=128 fits comfortably in the default scoped-VMEM budget on v5e/v6e/v7x with bf16
    inputs (~12 MiB incl. double-buffered x).  For larger tn also consider
    pipeline_mode=pl.Buffered(1) on the grid-invariant weight specs / raising
    vmem_limit_bytes.
    """
    N, H, W, C = x_nhwc.shape
    assert H == 8 and W == 8, "AuxiliaryHeadCIFAR assumes an 8x8 spatial input"

    c_mid = params["w1"].shape[1]            # 128
    c_out = params["w2"].shape[2]            # 768
    nc_pad = params["w3"].shape[1]           # 128 (zero-padded classifier)
    nc = params["num_classes"]

    x = x_nhwc.astype(jnp.bfloat16)

    # Batch tile: multiple of 8 sublanes; pad the batch to a whole number of tiles.
    tn = max(8, _round_up(tn, 8))
    tn_eff = min(tn, _round_up(N, 8))
    npad = _round_up(N, tn_eff)
    if npad != N:
        x = jnp.pad(x, ((0, npad - N), (0, 0), (0, 0), (0, 0)))

    out = pl.pallas_call(
        aux_head_kernel,
        out_shape=jax.ShapeDtypeStruct((npad, nc_pad), jnp.float32),
        grid=(npad // tn_eff,),
        in_specs=[
            pl.BlockSpec((tn_eff, H, W, C), lambda n: (n, 0, 0, 0)),
            pl.BlockSpec((C, c_mid), lambda n: (0, 0)),
            pl.BlockSpec((1, c_mid), lambda n: (0, 0)),
            pl.BlockSpec((1, c_mid), lambda n: (0, 0)),
            pl.BlockSpec((4, c_mid, c_out), lambda n: (0, 0, 0)),
            pl.BlockSpec((1, c_out), lambda n: (0, 0)),
            pl.BlockSpec((1, c_out), lambda n: (0, 0)),
            pl.BlockSpec((c_out, nc_pad), lambda n: (0, 0)),
            pl.BlockSpec((1, nc_pad), lambda n: (0, 0)),
        ],
        out_specs=pl.BlockSpec((tn_eff, nc_pad), lambda n: (n, 0)),
        compiler_params=pltpu.CompilerParams(
            dimension_semantics=("parallel",),
            vmem_limit_bytes=32 * 1024 * 1024,
        ),
    )(x, params["w1"], params["s1"], params["b1"],
      params["w2"], params["s2"], params["b2"], params["w3"], params["b3"])
    return out[:N, :nc]


def aux_head_cifar_from_nchw(x_nchw, params, *, tn=128):
    # Compatibility path only: a fused producer should emit NHWC directly so x is read
    # from HBM exactly once (this transpose is a full extra HBM pass over x).
    return aux_head_cifar(jnp.transpose(x_nchw, (0, 2, 3, 1)), params, tn=tn)


# ----------------------------------------------------------------------------
# Host-side parameter construction.
# ----------------------------------------------------------------------------
def fold_bn(gamma, beta, mean, var, eps=BN_EPS):
    scale = gamma * jax.lax.rsqrt(var + eps)
    return scale, beta - mean * scale


def init_params(key, C, num_classes, c_mid=128, c_out=768):
    ks = iter(jax.random.split(key, 16))

    def nrm(shape, scale):
        return scale * jax.random.normal(next(ks), shape, jnp.float32)

    # Conv / linear weights (bf16 for the MXU).  Layout mapping from PyTorch:
    #   w1[cin, cout]          == torch_conv1.weight[cout, cin, 0, 0]
    #   w2[kh*2+kw, cin, cout] == torch_conv2.weight[cout, cin, kh, kw]
    #   w3[cin, cls]           == torch_linear.weight[cls, cin];  b3[0, cls] == .bias[cls]
    w1 = nrm((C, c_mid), 0.1).astype(jnp.bfloat16)
    w2 = nrm((4, c_mid, c_out), 0.05).astype(jnp.bfloat16)
    w3 = nrm((c_out, num_classes), 0.05)
    b3 = nrm((1, num_classes), 0.1)

    # Zero-pad the classifier to 128 output lanes (lane-dense output store).
    nc_pad = max(128, _round_up(num_classes, 128))
    w3p = jnp.zeros((c_out, nc_pad), jnp.float32).at[:, :num_classes].set(w3)
    b3p = jnp.zeros((1, nc_pad), jnp.float32).at[:, :num_classes].set(b3)

    # Eval-mode BatchNorm parameters folded into per-channel scale/bias (f32).
    g1, be1 = 1.0 + nrm((c_mid,), 0.1), nrm((c_mid,), 0.1)
    m1, v1 = nrm((c_mid,), 0.1), 0.5 + jax.random.uniform(next(ks), (c_mid,), jnp.float32)
    g2, be2 = 1.0 + nrm((c_out,), 0.1), nrm((c_out,), 0.1)
    m2, v2 = nrm((c_out,), 0.1), 0.5 + jax.random.uniform(next(ks), (c_out,), jnp.float32)
    s1, b1 = fold_bn(g1, be1, m1, v1)
    s2, b2 = fold_bn(g2, be2, m2, v2)

    return {
        "w1": w1, "s1": s1.reshape(1, c_mid), "b1": b1.reshape(1, c_mid),
        "w2": w2, "s2": s2.reshape(1, c_out), "b2": b2.reshape(1, c_out),
        "w3": w3p.astype(jnp.bfloat16), "b3": b3p,
        "num_classes": num_classes,
    }


# ----------------------------------------------------------------------------
# Pure-JAX reference (independent formulation, f32) for validation.  NHWC input.
# ----------------------------------------------------------------------------
def aux_head_reference(x_nhwc, params):
    f32 = jnp.float32
    nc = params["num_classes"]
    w1 = params["w1"].astype(f32)
    w2 = params["w2"].astype(f32)
    w3 = params["w3"].astype(f32)[:, :nc]
    b3 = params["b3"][:, :nc]

    r = jnp.maximum(x_nhwc.astype(f32), 0.0)
    rows = []
    for i in range(2):
        cols = []
        for j in range(2):
            cols.append(jnp.mean(r[:, 3 * i:3 * i + 5, 3 * j:3 * j + 5, :], axis=(1, 2)))
        rows.append(jnp.stack(cols, axis=1))
    pooled = jnp.stack(rows, axis=1)                                # (N, 2, 2, C)

    h1 = jnp.einsum("nijc,cd->nijd", pooled, w1)
    h1 = jnp.maximum(h1 * params["s1"] + params["b1"], 0.0)         # (N, 2, 2, 128)

    w2r = w2.reshape(2, 2, w2.shape[1], w2.shape[2])
    h2 = jnp.einsum("nijc,ijcd->nd", h1, w2r)
    h2 = jnp.maximum(h2 * params["s2"] + params["b2"], 0.0)         # (N, 768)

    return jnp.dot(h2, w3) + b3


if __name__ == "__main__":
    key = jax.random.PRNGKey(0)
    kx, kp = jax.random.split(key, 2)

    N, C, H, W = 2, 128, 8, 8          # AuxiliaryHeadCIFAR assumes an 8x8 spatial input
    NUM_CLASSES = 10

    # PyTorch-style NCHW input; converted ONCE here in the test harness (a fused producer
    # would emit NHWC directly so the kernel path itself never pays a transpose).
    x_nchw = jax.random.normal(kx, (N, C, H, W), jnp.float32)
    x_nhwc = jnp.transpose(x_nchw, (0, 2, 3, 1))

    params = init_params(kp, C, NUM_CLASSES)

    out = aux_head_cifar(x_nhwc, params)
    out = jax.block_until_ready(out)

    assert out.shape == (N, NUM_CLASSES), out.shape
    assert bool(jnp.all(jnp.isfinite(out)))

    # Reference consumes the same bf16-rounded input the kernel sees (weights are shared),
    # so the tolerance only needs to cover bf16 rounding of the intermediates.
    ref = aux_head_reference(x_nhwc.astype(jnp.bfloat16).astype(jnp.float32), params)
    assert bool(jnp.allclose(out, ref, rtol=3e-2, atol=3e-2)), \
        float(jnp.max(jnp.abs(out - ref)))

    print("KERNEL_OK")
</pallas_src>

<mosaic_0001>
module attributes {stable_mosaic.version = 11 : i64} {
  func.func @aux_head_kernel(%arg0: i32, %arg1: memref<8x8x8x128xbf16, #tpu.memory_space<vmem>>, %arg2: memref<128x128xbf16, #tpu.memory_space<vmem>>, %arg3: memref<1x128xf32, #tpu.memory_space<vmem>>, %arg4: memref<1x128xf32, #tpu.memory_space<vmem>>, %arg5: memref<4x128x768xbf16, #tpu.memory_space<vmem>>, %arg6: memref<1x768xf32, #tpu.memory_space<vmem>>, %arg7: memref<1x768xf32, #tpu.memory_space<vmem>>, %arg8: memref<768x128xbf16, #tpu.memory_space<vmem>>, %arg9: memref<1x128xf32, #tpu.memory_space<vmem>>, %arg10: memref<8x128xf32, #tpu.memory_space<vmem>>) attributes {dimension_semantics = [#tpu.dimension_semantics<parallel>], iteration_bounds = array<i64: 1>, scalar_prefetch = 0 : i64, scratch_operands = 0 : i64, tpu.core_type = #tpu.core_type<tc>, window_params = [{transform_indices = @transform_0, window_bounds = array<i64: 8, 8, 8, 128>}, {pipeline_mode = #tpu.pipeline_mode<synchronous>, transform_indices = @transform_1, window_bounds = array<i64: 128, 128>}, {pipeline_mode = #tpu.pipeline_mode<synchronous>, transform_indices = @transform_2, window_bounds = array<i64: 1, 128>}, {pipeline_mode = #tpu.pipeline_mode<synchronous>, transform_indices = @transform_3, window_bounds = array<i64: 1, 128>}, {pipeline_mode = #tpu.pipeline_mode<synchronous>, transform_indices = @transform_4, window_bounds = array<i64: 4, 128, 768>}, {pipeline_mode = #tpu.pipeline_mode<synchronous>, transform_indices = @transform_5, window_bounds = array<i64: 1, 768>}, {pipeline_mode = #tpu.pipeline_mode<synchronous>, transform_indices = @transform_6, window_bounds = array<i64: 1, 768>}, {pipeline_mode = #tpu.pipeline_mode<synchronous>, transform_indices = @transform_7, window_bounds = array<i64: 768, 128>}, {pipeline_mode = #tpu.pipeline_mode<synchronous>, transform_indices = @transform_8, window_bounds = array<i64: 1, 128>}, {transform_indices = @transform_9, window_bounds = array<i64: 8, 128>}]} {
    %c0 = arith.constant 0 : index
    %c0_0 = arith.constant 0 : index
    %c0_1 = arith.constant 0 : index
    %c0_2 = arith.constant 0 : index
    %0 = vector.load %arg1[%c0, %c0_0, %c0_1, %c0_2] : memref<8x8x8x128xbf16, #tpu.memory_space<vmem>>, vector<8x8x8x128xbf16>
    %1 = vector.extract_strided_slice %0 {offsets = [0, 3, 0, 0], sizes = [8, 1, 8, 128], strides = [1, 1, 1, 1]} : vector<8x8x8x128xbf16> to vector<8x1x8x128xbf16>
    %2 = vector.shape_cast %1 : vector<8x1x8x128xbf16> to vector<8x8x128xbf16>
    %3 = arith.extf %2 : vector<8x8x128xbf16> to vector<8x8x128xf32>
    %cst = arith.constant 0.000000e+00 : f32
    %4 = vector.broadcast %cst : f32 to vector<8x8x128xf32>
    %5 = arith.maximumf %3, %4 : vector<8x8x128xf32>
    %6 = vector.extract_strided_slice %0 {offsets = [0, 4, 0, 0], sizes = [8, 1, 8, 128], strides = [1, 1, 1, 1]} : vector<8x8x8x128xbf16> to vector<8x1x8x128xbf16>
    %7 = vector.shape_cast %6 : vector<8x1x8x128xbf16> to vector<8x8x128xbf16>
    %8 = arith.extf %7 : vector<8x8x128xbf16> to vector<8x8x128xf32>
    %cst_3 = arith.constant 0.000000e+00 : f32
    %9 = vector.broadcast %cst_3 : f32 to vector<8x8x128xf32>
    %10 = arith.maximumf %8, %9 : vector<8x8x128xf32>
    %11 = arith.addf %5, %10 : vector<8x8x128xf32>
    %12 = vector.extract_strided_slice %0 {offsets = [0, 0, 0, 0], sizes = [8, 1, 8, 128], strides = [1, 1, 1, 1]} : vector<8x8x8x128xbf16> to vector<8x1x8x128xbf16>
    %13 = vector.shape_cast %12 : vector<8x1x8x128xbf16> to vector<8x8x128xbf16>
    %14 = arith.extf %13 : vector<8x8x128xbf16> to vector<8x8x128xf32>
    %cst_4 = arith.constant 0.000000e+00 : f32
    %15 = vector.broadcast %cst_4 : f32 to vector<8x8x128xf32>
    %16 = arith.maximumf %14, %15 : vector<8x8x128xf32>
    %17 = vector.extract_strided_slice %0 {offsets = [0, 1, 0, 0], sizes = [8, 1, 8, 128], strides = [1, 1, 1, 1]} : vector<8x8x8x128xbf16> to vector<8x1x8x128xbf16>
    %18 = vector.shape_cast %17 : vector<8x1x8x128xbf16> to vector<8x8x128xbf16>
    %19 = arith.extf %18 : vector<8x8x128xbf16> to vector<8x8x128xf32>
    %cst_5 = arith.constant 0.000000e+00 : f32
    %20 = vector.broadcast %cst_5 : f32 to vector<8x8x128xf32>
    %21 = arith.maximumf %19, %20 : vector<8x8x128xf32>
    %22 = arith.addf %16, %21 : vector<8x8x128xf32>
    %23 = vector.extract_strided_slice %0 {offsets = [0, 2, 0, 0], sizes = [8, 1, 8, 128], strides = [1, 1, 1, 1]} : vector<8x8x8x128xbf16> to vector<8x1x8x128xbf16>
    %24 = vector.shape_cast %23 : vector<8x1x8x128xbf16> to vector<8x8x128xbf16>
    %25 = arith.extf %24 : vector<8x8x128xbf16> to vector<8x8x128xf32>
    %cst_6 = arith.constant 0.000000e+00 : f32
    %26 = vector.broadcast %cst_6 : f32 to vector<8x8x128xf32>
    %27 = arith.maximumf %25, %26 : vector<8x8x128xf32>
    %28 = arith.addf %22, %27 : vector<8x8x128xf32>
    %29 = arith.addf %28, %11 : vector<8x8x128xf32>
    %30 = vector.extract_strided_slice %0 {offsets = [0, 5, 0, 0], sizes = [8, 1, 8, 128], strides = [1, 1, 1, 1]} : vector<8x8x8x128xbf16> to vector<8x1x8x128xbf16>
    %31 = vector.shape_cast %30 : vector<8x1x8x128xbf16> to vector<8x8x128xbf16>
    %32 = arith.extf %31 : vector<8x8x128xbf16> to vector<8x8x128xf32>
    %cst_7 = arith.constant 0.000000e+00 : f32
    %33 = vector.broadcast %cst_7 : f32 to vector<8x8x128xf32>
    %34 = arith.maximumf %32, %33 : vector<8x8x128xf32>
    %35 = arith.addf %11, %34 : vector<8x8x128xf32>
    %36 = vector.extract_strided_slice %0 {offsets = [0, 6, 0, 0], sizes = [8, 1, 8, 128], strides = [1, 1, 1, 1]} : vector<8x8x8x128xbf16> to vector<8x1x8x128xbf16>
    %37 = vector.shape_cast %36 : vector<8x1x8x128xbf16> to vector<8x8x128xbf16>
    %38 = arith.extf %37 : vector<8x8x128xbf16> to vector<8x8x128xf32>
    %cst_8 = arith.constant 0.000000e+00 : f32
    %39 = vector.broadcast %cst_8 : f32 to vector<8x8x128xf32>
    %40 = arith.maximumf %38, %39 : vector<8x8x128xf32>
    %41 = arith.addf %35, %40 : vector<8x8x128xf32>
    %42 = vector.extract_strided_slice %0 {offsets = [0, 7, 0, 0], sizes = [8, 1, 8, 128], strides = [1, 1, 1, 1]} : vector<8x8x8x128xbf16> to vector<8x1x8x128xbf16>
    %43 = vector.shape_cast %42 : vector<8x1x8x128xbf16> to vector<8x8x128xbf16>
    %44 = arith.extf %43 : vector<8x8x128xbf16> to vector<8x8x128xf32>
    %cst_9 = arith.constant 0.000000e+00 : f32
    %45 = vector.broadcast %cst_9 : f32 to vector<8x8x128xf32>
    %46 = arith.maximumf %44, %45 : vector<8x8x128xf32>
    %47 = arith.addf %41, %46 : vector<8x8x128xf32>
    %48 = vector.extract_strided_slice %29 {offsets = [0, 0, 0], sizes = [8, 5, 128], strides = [1, 1, 1]} : vector<8x8x128xf32> to vector<8x5x128xf32>
    %cst_10 = arith.constant dense<0.000000e+00> : vector<8x128xf32>
    %49 = vector.multi_reduction <add>, %48, %cst_10 [1] : vector<8x5x128xf32> to vector<8x128xf32>
    %50 = vector.extract_strided_slice %29 {offsets = [0, 3, 0], sizes = [8, 5, 128], strides = [1, 1, 1]} : vector<8x8x128xf32> to vector<8x5x128xf32>
    %cst_11 = arith.constant dense<0.000000e+00> : vector<8x128xf32>
    %51 = vector.multi_reduction <add>, %50, %cst_11 [1] : vector<8x5x128xf32> to vector<8x128xf32>
    %52 = vector.extract_strided_slice %47 {offsets = [0, 0, 0], sizes = [8, 5, 128], strides = [1, 1, 1]} : vector<8x8x128xf32> to vector<8x5x128xf32>
    %cst_12 = arith.constant dense<0.000000e+00> : vector<8x128xf32>
    %53 = vector.multi_reduction <add>, %52, %cst_12 [1] : vector<8x5x128xf32> to vector<8x128xf32>
    %54 = vector.extract_strided_slice %47 {offsets = [0, 3, 0], sizes = [8, 5, 128], strides = [1, 1, 1]} : vector<8x8x128xf32> to vector<8x5x128xf32>
    %cst_13 = arith.constant dense<0.000000e+00> : vector<8x128xf32>
    %55 = vector.multi_reduction <add>, %54, %cst_13 [1] : vector<8x5x128xf32> to vector<8x128xf32>
    %56 = tpu.concatenate %49, %51, %53, %55 in 0 : vector<8x128xf32>, vector<8x128xf32>, vector<8x128xf32>, vector<8x128xf32> -> vector<32x128xf32>
    %cst_14 = arith.constant 4.000000e-02 : f32
    %57 = vector.broadcast %cst_14 : f32 to vector<32x128xf32>
    %58 = arith.mulf %56, %57 : vector<32x128xf32>
    %59 = arith.truncf %58 : vector<32x128xf32> to vector<32x128xbf16>
    %c0_15 = arith.constant 0 : index
    %c0_16 = arith.constant 0 : index
    %60 = vector.load %arg2[%c0_15, %c0_16] : memref<128x128xbf16, #tpu.memory_space<vmem>>, vector<128x128xbf16>
    %cst_17 = arith.constant dense<0.000000e+00> : vector<32x128xf32>
    %61 = tpu.matmul %59, %60, %cst_17 {dimension_numbers = #tpu.dot_dimension_numbers<[1], [0], [0], [1], [0, 0, 1, 1], [], []>} : vector<32x128xbf16>, vector<128x128xbf16>, vector<32x128xf32> -> vector<32x128xf32>
    %c0_18 = arith.constant 0 : index
    %c0_19 = arith.constant 0 : index
    %62 = vector.load %arg3[%c0_18, %c0_19] : memref<1x128xf32, #tpu.memory_space<vmem>>, vector<1x128xf32>
    %63 = vector.broadcast %62 : vector<1x128xf32> to vector<32x128xf32>
    %64 = arith.mulf %61, %63 : vector<32x128xf32>
    %c0_20 = arith.constant 0 : index
    %c0_21 = arith.constant 0 : index
    %65 = vector.load %arg4[%c0_20, %c0_21] : memref<1x128xf32, #tpu.memory_space<vmem>>, vector<1x128xf32>
    %66 = vector.broadcast %65 : vector<1x128xf32> to vector<32x128xf32>
    %67 = arith.addf %64, %66 : vector<32x128xf32>
    %cst_22 = arith.constant 0.000000e+00 : f32
    %68 = vector.broadcast %cst_22 : f32 to vector<32x128xf32>
    %69 = arith.maximumf %67, %68 : vector<32x128xf32>
    %70 = arith.truncf %69 : vector<32x128xf32> to vector<32x128xbf16>
    %c0_23 = arith.constant 0 : index
    %c0_24 = arith.constant 0 : index
    %c0_25 = arith.constant 0 : index
    %71 = vector.load %arg5[%c0_23, %c0_24, %c0_25] : memref<4x128x768xbf16, #tpu.memory_space<vmem>>, vector<4x128x768xbf16>
    %72 = vector.extract_strided_slice %70 {offsets = [0, 0], sizes = [8, 128], strides = [1, 1]} : vector<32x128xbf16> to vector<8x128xbf16>
    %73 = vector.extract_strided_slice %71 {offsets = [0, 0, 0], sizes = [1, 128, 768], strides = [1, 1, 1]} : vector<4x128x768xbf16> to vector<1x128x768xbf16>
    %74 = vector.shape_cast %73 : vector<1x128x768xbf16> to vector<128x768xbf16>
    %cst_26 = arith.constant dense<0.000000e+00> : vector<8x768xf32>
    %75 = tpu.matmul %72, %74, %cst_26 {dimension_numbers = #tpu.dot_dimension_numbers<[1], [0], [0], [1], [0, 0, 1, 1], [], []>} : vector<8x128xbf16>, vector<128x768xbf16>, vector<8x768xf32> -> vector<8x768xf32>
    %76 = vector.extract_strided_slice %70 {offsets = [8, 0], sizes = [8, 128], strides = [1, 1]} : vector<32x128xbf16> to vector<8x128xbf16>
    %77 = vector.extract_strided_slice %71 {offsets = [1, 0, 0], sizes = [1, 128, 768], strides = [1, 1, 1]} : vector<4x128x768xbf16> to vector<1x128x768xbf16>
    %78 = vector.shape_cast %77 : vector<1x128x768xbf16> to vector<128x768xbf16>
    %cst_27 = arith.constant dense<0.000000e+00> : vector<8x768xf32>
    %79 = tpu.matmul %76, %78, %cst_27 {dimension_numbers = #tpu.dot_dimension_numbers<[1], [0], [0], [1], [0, 0, 1, 1], [], []>} : vector<8x128xbf16>, vector<128x768xbf16>, vector<8x768xf32> -> vector<8x768xf32>
    %80 = arith.addf %75, %79 : vector<8x768xf32>
    %81 = vector.extract_strided_slice %70 {offsets = [16, 0], sizes = [8, 128], strides = [1, 1]} : vector<32x128xbf16> to vector<8x128xbf16>
    %82 = vector.extract_strided_slice %71 {offsets = [2, 0, 0], sizes = [1, 128, 768], strides = [1, 1, 1]} : vector<4x128x768xbf16> to vector<1x128x768xbf16>
    %83 = vector.shape_cast %82 : vector<1x128x768xbf16> to vector<128x768xbf16>
    %cst_28 = arith.constant dense<0.000000e+00> : vector<8x768xf32>
    %84 = tpu.matmul %81, %83, %cst_28 {dimension_numbers = #tpu.dot_dimension_numbers<[1], [0], [0], [1], [0, 0, 1, 1], [], []>} : vector<8x128xbf16>, vector<128x768xbf16>, vector<8x768xf32> -> vector<8x768xf32>
    %85 = arith.addf %80, %84 : vector<8x768xf32>
    %86 = vector.extract_strided_slice %70 {offsets = [24, 0], sizes = [8, 128], strides = [1, 1]} : vector<32x128xbf16> to vector<8x128xbf16>
    %87 = vector.extract_strided_slice %71 {offsets = [3, 0, 0], sizes = [1, 128, 768], strides = [1, 1, 1]} : vector<4x128x768xbf16> to vector<1x128x768xbf16>
    %88 = vector.shape_cast %87 : vector<1x128x768xbf16> to vector<128x768xbf16>
    %cst_29 = arith.constant dense<0.000000e+00> : vector<8x768xf32>
    %89 = tpu.matmul %86, %88, %cst_29 {dimension_numbers = #tpu.dot_dimension_numbers<[1], [0], [0], [1], [0, 0, 1, 1], [], []>} : vector<8x128xbf16>, vector<128x768xbf16>, vector<8x768xf32> -> vector<8x768xf32>
    %90 = arith.addf %85, %89 : vector<8x768xf32>
    %c0_30 = arith.constant 0 : index
    %c0_31 = arith.constant 0 : index
    %91 = vector.load %arg6[%c0_30, %c0_31] : memref<1x768xf32, #tpu.memory_space<vmem>>, vector<1x768xf32>
    %92 = vector.broadcast %91 : vector<1x768xf32> to vector<8x768xf32>
    %93 = arith.mulf %90, %92 : vector<8x768xf32>
    %c0_32 = arith.constant 0 : index
    %c0_33 = arith.constant 0 : index
    %94 = vector.load %arg7[%c0_32, %c0_33] : memref<1x768xf32, #tpu.memory_space<vmem>>, vector<1x768xf32>
    %95 = vector.broadcast %94 : vector<1x768xf32> to vector<8x768xf32>
    %96 = arith.addf %93, %95 : vector<8x768xf32>
    %cst_34 = arith.constant 0.000000e+00 : f32
    %97 = vector.broadcast %cst_34 : f32 to vector<8x768xf32>
    %98 = arith.maximumf %96, %97 : vector<8x768xf32>
    %99 = arith.truncf %98 : vector<8x768xf32> to vector<8x768xbf16>
    %c0_35 = arith.constant 0 : index
    %c0_36 = arith.constant 0 : index
    %100 = vector.load %arg8[%c0_35, %c0_36] : memref<768x128xbf16, #tpu.memory_space<vmem>>, vector<768x128xbf16>
    %cst_37 = arith.constant dense<0.000000e+00> : vector<8x128xf32>
    %101 = tpu.matmul %99, %100, %cst_37 {dimension_numbers = #tpu.dot_dimension_numbers<[1], [0], [0], [1], [0, 0, 1, 1], [], []>} : vector<8x768xbf16>, vector<768x128xbf16>, vector<8x128xf32> -> vector<8x128xf32>
    %c0_38 = arith.constant 0 : index
    %c0_39 = arith.constant 0 : index
    %102 = vector.load %arg9[%c0_38, %c0_39] : memref<1x128xf32, #tpu.memory_space<vmem>>, vector<1x128xf32>
    %103 = vector.broadcast %102 : vector<1x128xf32> to vector<8x128xf32>
    %104 = arith.addf %101, %103 : vector<8x128xf32>
    %c0_40 = arith.constant 0 : index
    %c0_41 = arith.constant 0 : index
    %105 = vector.load %arg10[%c0_40, %c0_41] : memref<8x128xf32, #tpu.memory_space<vmem>>, vector<8x128xf32>
    tpu.vector_store %arg10[%c0_40, %c0_41], %104 {strides = array<i32>} : memref<8x128xf32, #tpu.memory_space<vmem>>, vector<8x128xf32>,
    return
  }
  func.func @transform_0(%arg0: i32) -> (i32, i32, i32, i32) {
    %c0_i32 = arith.constant 0 : i32
    %c0_i32_0 = arith.constant 0 : i32
    %c0_i32_1 = arith.constant 0 : i32
    %c0_i32_2 = arith.constant 0 : i32
    return %arg0, %c0_i32, %c0_i32_0, %c0_i32_1 : i32, i32, i32, i32
  }
  func.func @transform_1(%arg0: i32) -> (i32, i32) {
    %c0_i32 = arith.constant 0 : i32
    %c0_i32_0 = arith.constant 0 : i32
    %c0_i32_1 = arith.constant 0 : i32
    return %c0_i32, %c0_i32_0 : i32, i32
  }
  func.func @transform_2(%arg0: i32) -> (i32, i32) {
    %c0_i32 = arith.constant 0 : i32
    %c0_i32_0 = arith.constant 0 : i32
    %c0_i32_1 = arith.constant 0 : i32
    return %c0_i32, %c0_i32_0 : i32, i32
  }
  func.func @transform_3(%arg0: i32) -> (i32, i32) {
    %c0_i32 = arith.constant 0 : i32
    %c0_i32_0 = arith.constant 0 : i32
    %c0_i32_1 = arith.constant 0 : i32
    return %c0_i32, %c0_i32_0 : i32, i32
  }
  func.func @transform_4(%arg0: i32) -> (i32, i32, i32) {
    %c0_i32 = arith.constant 0 : i32
    %c0_i32_0 = arith.constant 0 : i32
    %c0_i32_1 = arith.constant 0 : i32
    %c0_i32_2 = arith.constant 0 : i32
    return %c0_i32, %c0_i32_0, %c0_i32_1 : i32, i32, i32
  }
  func.func @transform_5(%arg0: i32) -> (i32, i32) {
    %c0_i32 = arith.constant 0 : i32
    %c0_i32_0 = arith.constant 0 : i32
    %c0_i32_1 = arith.constant 0 : i32
    return %c0_i32, %c0_i32_0 : i32, i32
  }
  func.func @transform_6(%arg0: i32) -> (i32, i32) {
    %c0_i32 = arith.constant 0 : i32
    %c0_i32_0 = arith.constant 0 : i32
    %c0_i32_1 = arith.constant 0 : i32
    return %c0_i32, %c0_i32_0 : i32, i32
  }
  func.func @transform_7(%arg0: i32) -> (i32, i32) {
    %c0_i32 = arith.constant 0 : i32
    %c0_i32_0 = arith.constant 0 : i32
    %c0_i32_1 = arith.constant 0 : i32
    return %c0_i32, %c0_i32_0 : i32, i32
  }
  func.func @transform_8(%arg0: i32) -> (i32, i32) {
    %c0_i32 = arith.constant 0 : i32
    %c0_i32_0 = arith.constant 0 : i32
    %c0_i32_1 = arith.constant 0 : i32
    return %c0_i32, %c0_i32_0 : i32, i32
  }
  func.func @transform_9(%arg0: i32) -> (i32, i32) {
    %c0_i32 = arith.constant 0 : i32
    %c0_i32_0 = arith.constant 0 : i32
    return %arg0, %c0_i32 : i32, i32
  }
}

</mosaic_0001>

<bundles_post_ra>
// kernel: tpu_custom_call.1
= control target key start
LH: loop header
LB: loop body
LE: loop exit
PB: predicated region body
PF: predicated region fallthrough
CT: control target
= control target key end

     0   :  { %14 = vsyncpa [#allocation3], 0  ;;  %s4689_s0 = inlined_call_operand.hbm [shape: bf16[8,8,8,128], index: 0, kind: input, shape index: {}]   ;;  %s4690_s1 = inlined_call_operand.hbm [shape: bf16[128,128], index: 1, kind: input, shape index: {}]   ;;  %s4691_s2 = inlined_call_operand.vmem [shape: f32[1,128], index: 2, kind: input, shape index: {}]   ;;  %s4692_s3 = inlined_call_operand.vmem [shape: f32[1,128], index: 3, kind: input, shape index: {}]   ;;  %s4693_s4 = inlined_call_operand.hbm [shape: bf16[4,128,768], index: 4, kind: input, shape index: {}]   ;;  %s4694_s5 = inlined_call_operand.vmem [shape: f32[1,768], index: 5, kind: input, shape index: {}]   ;;  %s4695_s6 = inlined_call_operand.hbm [shape: f32[1,768], index: 6, kind: input, shape index: {}]   ;;  %s4696_s7 = inlined_call_operand.hbm [shape: bf16[768,128], index: 7, kind: input, shape index: {}]   ;;  %s4697_s8 = inlined_call_operand.vmem [shape: f32[1,128], index: 8, kind: input, shape index: {}]   ;;  %s4698_s9 = inlined_call_operand.hbm [shape: f32[8,128], index: 9, kind: output, shape index: {}]  }
   0x1   :  { %15 = vsyncpa [#allocation6], 0 }
   0x2   :  { %16 = vsyncpa [#allocation9], 0 }
   0x3   :  { %17 = vsyncpa [#allocation4], 0  ;;  %s4107_s30 = smov [#allocation5]   ;;  %s4108_s11 = smov [#allocation8]  }
   0x4   :  { %s35_s10 = sshll.u32 %s4107_s30, 4  ;;  %s66_s12 = sshll.u32 %s4108_s11, 4  ;;  %s36_s10 = int_to_ptr.vmem [resolvable:$true] %s35_s10  ;;  %s67_s12 = int_to_ptr.vmem [resolvable:$true] %s66_s12 }
   0x5   :  { %s3987_s13 = scalar_lea.vmem %s36_s10, 1024  ;;  %p3992_p1 = scmp.lt.s32.totalorder %s36_s10, %s36_s10 }
   0x6   :  { %p3988_p0 = scmp.ne.s32.totalorder %s36_s10, %s3987_s13  ;;  %p3993_p2 = scmp.lt.s32.totalorder %s3987_s13, %s3987_s13 }
   0x8   :  { %p3994_p3 = por %p3993_p2, %p3992_p1 }
   0xa   :  { %p3995_p4 = pnand %p3994_p3, %p3988_p0 }
   0xc   :  { %3998 = shalt.err (!%p3995_p4)
}
   0xd   :  { %s4109_s14 = smov 64   ;;  %s4110_s15 = smov 4  }
   0xe   :  { %41 = dma.hbm_to_vmem [thread:$0]  %s4690_s1, 1024, %s36_s10, [#allocation6], %s4109_s14, %s4109_s14, %s4110_s15  }
   0xf   :  { %s4007_s18 = scalar_lea.vmem %s67_s12, 96  ;;  %p4012_p6 = scmp.lt.s32.totalorder %s67_s12, %s67_s12 }
  0x10   :  { %p4008_p5 = scmp.ne.s32.totalorder %s67_s12, %s4007_s18  ;;  %p4013_p7 = scmp.lt.s32.totalorder %s4007_s18, %s4007_s18 }
  0x12   :  { %p4014_p8 = por %p4013_p7, %p4012_p6 }
  0x14   :  { %p4015_p9 = pnand %p4014_p8, %p4008_p5 }
  0x16   :  { %4018 = shalt.err (!%p4015_p9)
}
  0x17   :  { %69 = dma.hbm_to_vmem [thread:$0]  %s4695_s6, 96, %s67_s12, [#allocation9]  }
  0x18   :  { %s4111_s21 = smov [#allocation2]   ;;  %s4112_s23 = smov [#allocation7]  }
  0x19   :  { %s23_s22 = sshll.u32 %s4111_s21, 4  ;;  %s51_s24 = sshll.u32 %s4112_s23, 4  ;;  %s24_s22 = int_to_ptr.vmem [resolvable:$true] %s23_s22  ;;  %s52_s24 = int_to_ptr.vmem [resolvable:$true] %s51_s24 }
  0x1a   :  { %s4027_s25 = scalar_lea.vmem %s24_s22, 4096  ;;  %p4032_p11 = scmp.lt.s32.totalorder %s24_s22, %s24_s22 }
  0x1b   :  { %p4028_p10 = scmp.ne.s32.totalorder %s24_s22, %s4027_s25  ;;  %p4033_p12 = scmp.lt.s32.totalorder %s4027_s25, %s4027_s25 }
  0x1d   :  { %p4034_p13 = por %p4033_p12, %p4032_p11 }
  0x1f   :  { %p4035_p0 = pnand %p4034_p13, %p4028_p10 }
  0x21   :  { %4038 = shalt.err (!%p4035_p0)
}
  0x22   :  { %29 = dma.hbm_to_vmem [thread:$0]  %s4689_s0, 4096, %s24_s22, [#allocation3], %s4109_s14, %s4109_s14, %s4110_s15  }
  0x23   :  { %s4047_s6 = scalar_lea.vmem %s52_s24, 24576  ;;  %p4052_p2 = scmp.lt.s32.totalorder %s52_s24, %s52_s24 }
  0x24   :  { %p4048_p1 = scmp.ne.s32.totalorder %s52_s24, %s4047_s6  ;;  %p4053_p3 = scmp.lt.s32.totalorder %s4047_s6, %s4047_s6 }
  0x26   :  { %p4054_p4 = por %p4053_p3, %p4052_p2 }
  0x28   :  { %p4055_p5 = pnand %p4054_p4, %p4048_p1 }
  0x2a   :  { %4058 = shalt.err (!%p4055_p5)
}
  0x2b   :  { %s4113_s27 = smov 384   ;;  %s4114_s28 = smov 24  }
  0x2c   :  { %57 = dma.hbm_to_vmem [thread:$0]  %s4693_s4, 24576, %s52_s24, [#allocation6], %s4113_s27, %s4113_s27, %s4114_s28  }
  0x2d   :  { %s4115_s10 = smov [#allocation10]  }
  0x2e   :  { %s75_s11 = sshll.u32 %s4115_s10, 4  ;;  %s76_s11 = int_to_ptr.vmem [resolvable:$true] %s75_s11 }
  0x2f   :  { %s4067_s12 = scalar_lea.vmem %s76_s11, 6144  ;;  %p4072_p7 = scmp.lt.s32.totalorder %s76_s11, %s76_s11 }
  0x30   :  { %p4068_p6 = scmp.ne.s32.totalorder %s76_s11, %s4067_s12  ;;  %p4073_p8 = scmp.lt.s32.totalorder %s4067_s12, %s4067_s12 }
  0x32   :  { %p4074_p9 = por %p4073_p8, %p4072_p7 }
  0x34   :  { %p4075_p10 = pnand %p4074_p9, %p4068_p6 }
  0x36   :  { %4078 = shalt.err (!%p4075_p10)
}
  0x37   :  { %81 = dma.hbm_to_vmem [thread:$0]  %s4696_s7, 6144, %s76_s11, [#allocation9], %s4109_s14, %s4109_s14, %s4110_s15  }
  0x38   :  { %4099 = dma.done.wait [#allocation3], 4096  }
  0x39   :  { %4100 = vsyncadd [#allocation3], 4294963200 }
  0x3a   :  { %4101 = dma.done.wait [#allocation6], 25600  }
  0x3b   :  { %4102 = vsyncadd [#allocation6], 4294941696 }
  0x3c   :  { %4103 = dma.done.wait [#allocation9], 6240  }
  0x3d   :  { %4104 = vsyncadd [#allocation9], 4294961056  ;;  %v3635_v0 = vld [vmem:[#allocation5 + $0x38] sm:$0xff]   ;;  %v3636_v1 = vld [vmem:[#allocation5 + $0x30] sm:$0xff]   ;;  %vm348_vm0 = vcmask 1044480   ;;  %vm629_vm1 = vcmask 1041409  }
  0x3e   :  { %3604 = vmatprep.subr.bf16.mxu0 %v3635_v0  ;;  %v3637_v2 = vld [vmem:[#allocation5 + $0x28] sm:$0xff]   ;;  %v3638_v3 = vld [vmem:[#allocation5 + $0x20] sm:$0xff]   ;;  %v4196_v6 = vld [vmem:[#allocation2 + $0x10] sm:$0xff]   ;;  %vm631_vm2 = vcmask 1042434   ;;  %vm633_vm3 = vcmask 1043459   ;;  %vm635_vm4 = vcmask 1044484  }
  0x3f   :  { %3605 = vmatpush3.bf16.msra.mxu0 %v3635_v0  ;;  %v4192_v4 = vld [vmem:[#allocation2] sm:$0xff]   ;;  %v4194_v5 = vld [vmem:[#allocation2 + $0x8] sm:$0xff]   ;;  %v4206_v13 = vld [vmem:[#allocation2 + $0x30] sm:$0xff]   ;;  %v3379_v14 = vunpack.c.l.bf16 %v4196_v6  ;;  %vm637_vm5 = vcmask 1045509   ;;  %vm639_vm6 = vcmask 1046534   ;;  %vm641_vm7 = vcmask 1047559  }
  0x40   :  { %3606 = vmatprep.subr.bf16.mxu0 %v3636_v1  ;;  %v3371_v7 = vunpack.c.l.bf16 %v4192_v4  ;;  %v3376_v10 = vunpack.c.h.bf16 %v4194_v5  ;;  %v4202_v11 = vld [vmem:[#allocation2 + $0x20] sm:$0xff]   ;;  %v4204_v12 = vld [vmem:[#allocation2 + $0x28] sm:$0xff]   ;;  %v4216_v20 = vld [vmem:[#allocation2 + $0x50] sm:$0xff]   ;;  %v3395_v23 = vunpack.c.l.bf16 %v4206_v13  ;;  %s4117_s17 = smov [#allocation11]  }
  0x41   :  { %v3387_v16 = vunpack.c.l.bf16 %v4202_v11  ;;  %v4212_v18 = vld [vmem:[#allocation2 + $0x40] sm:$0xff]   ;;  %v4214_v19 = vld [vmem:[#allocation2 + $0x48] sm:$0xff]   ;;  %v3392_v22 = vunpack.c.h.bf16 %v4204_v12  ;;  %v4226_v27 = vld [vmem:[#allocation2 + $0x70] sm:$0xff]   ;;  %v3411_v35 = vunpack.c.l.bf16 %v4216_v20  ;;  %v188_v17 = vmax.f32 %v3379_v14, 0.0  ;;  %s3107_s18 = sshll.u32 %s4117_s17, 4  ;;  %s3108_s18 = int_to_ptr.vmem [resolvable:$true] %s3107_s18 }
  0x42   :  { %v4222_v25 = vld [vmem:[#allocation2 + $0x60] sm:$0xff]   ;;  %v4224_v26 = vld [vmem:[#allocation2 + $0x68] sm:$0xff]   ;;  %v3639_v28 = vld [vmem:[#allocation5 + $0x18] sm:$0xff]   ;;  %v3403_v29 = vunpack.c.l.bf16 %v4212_v18  ;;  %v3408_v32 = vunpack.c.h.bf16 %v4214_v19  ;;  %v3427_v43 = vunpack.c.l.bf16 %v4226_v27  ;;  %v189_v21 = vmax.f32 %v3395_v23, 0.0  ;;  %s4079_s19 = scalar_lea.vmem %s3108_s18, 128  ;;  %p4084_p12 = scmp.lt.s32.totalorder %s3108_s18, %s3108_s18 }
  0x43   :  { %3607 = vmatpush3.bf16.msra.mxu0 %v3636_v1  ;;  %v4232_v33 = vld [vmem:[#allocation2 + $0x80] sm:$0xff]   ;;  %v4234_v34 = vld [vmem:[#allocation2 + $0x88] sm:$0xff]   ;;  %v3419_v37 = vunpack.c.l.bf16 %v4222_v25  ;;  %v4240_v39 = vld [vmem:[#allocation2 + $0x90] sm:$0xff]   ;;  %v3424_v42 = vunpack.c.h.bf16 %v4224_v26  ;;  %v173_v24 = vmax.f32 %v3392_v22, 0.0  ;;  %p4080_p11 = scmp.ne.s32.totalorder %s3108_s18, %s4079_s19  ;;  %p4085_p13 = scmp.lt.s32.totalorder %s4079_s19, %s4079_s19 }
  0x44   :  { %3608 = vmatprep.subr.bf16.mxu0 %v3637_v2  ;;  %v4242_v40 = vld [vmem:[#allocation2 + $0xa0] sm:$0xff]   ;;  %v4248_v45 = vld [vmem:[#allocation2 + $0xa8] sm:$0xff]   ;;  %v4250_v46 = vld [vmem:[#allocation2 + $0xb0] sm:$0xff]   ;;  %v3435_v47 = vunpack.c.l.bf16 %v4232_v33  ;;  %v3440_v50 = vunpack.c.h.bf16 %v4234_v34  ;;  %v3443_v54 = vunpack.c.l.bf16 %v4240_v39  ;;  %v174_v9 = vmax.f32 %v3408_v32, 0.0 }
  0x45   :  { %v4256_v51 = vld [vmem:[#allocation2 + $0xc0] sm:$0xff]   ;;  %v4258_v52 = vld [vmem:[#allocation2 + $0xc8] sm:$0xff]   ;;  %v3640_v53 = vld [vmem:[#allocation5 + $0x10] sm:$0xff]   ;;  %v3456_v61 = vunpack.c.h.bf16 %v4248_v45  ;;  %v3459_v62 = vunpack.c.l.bf16 %v4250_v46  ;;  %v191_v8 = vmax.f32 %v3427_v43, 0.0  ;;  %p4086_p0 = por %p4085_p13, %p4084_p12 }
  0x46   :  { %v4264_v58 = vld [vmem:[#allocation2 + $0xd0] sm:$0xff]   ;;  %v4266_v59 = vld [vmem:[#allocation2 + $0xe0] sm:$0xff]   ;;  %v4272_v0 = vld [vmem:[#allocation2 + $0xe8] sm:$0xff]   ;;  %v3472_v44 = vunpack.c.h.bf16 %v4258_v52  ;;  %v176_v48 = vmax.f32 %v3440_v50, 0.0  ;;  %v192_v32 = vmax.f32 %v3443_v54, 0.0 }
  0x47   :  { %3609 = vmatpush3.bf16.msra.mxu0 %v3637_v2  ;;  %v4274_v1 = vld [vmem:[#allocation2 + $0xf0] sm:$0xff]   ;;  %v3467_v2 = vunpack.c.l.bf16 %v4256_v51  ;;  %v3475_v36 = vunpack.c.l.bf16 %v4264_v58  ;;  %v3483_v15 = vunpack.c.l.bf16 %v4266_v59  ;;  %v3484_v63 = vunpack.c.h.bf16 %v4266_v59  ;;  %v3641_v49 = vld [vmem:[#allocation5 + $0x8] sm:$0xff]   ;;  %v3642_v57 = vld [vmem:[#allocation5] sm:$0xff]   ;;  %p4087_p1 = pnand %p4086_p0, %p4080_p11 }
  0x48   :  { %3610 = vmatprep.subr.bf16.mxu0 %v3638_v3  ;;  %v3643_v60 = vld [vmem:[#allocation7 + $0x2d4] ss:$24 sps:$4 sm:$0xff]   ;;  %v3488_v31 = vunpack.c.h.bf16 %v4272_v0  ;;  %v3491_v55 = vunpack.c.l.bf16 %v4274_v1  ;;  %v3648_v59 = vld [vmem:[#allocation7 + $0x2d0] ss:$24 sps:$4 sm:$0xff]   ;;  %v177_v38 = vmax.f32 %v3456_v61, 0.0  ;;  %v178_v41 = vmax.f32 %v3472_v44, 0.0 }
  0x49   :  { %1274 = vmatprep.subr.bf16.mxu1 %v3643_v60  ;;  %v3649_v22 = vld [vmem:[#allocation7 + $0x2a4] ss:$24 sps:$4 sm:$0xff]   ;;  %v194_v60 = vmax.f32 %v3475_v36, 0.0  ;;  %v4298_v44 = vadd.f32 %v189_v21, %v173_v24  ;;  %v3654_v14 = vld [vmem:[#allocation7 + $0x2a0] ss:$24 sps:$4 sm:$0xff]   ;;  %v4304_v23 = vadd.f32 %v192_v32, %v176_v48  ;;  %v215_v21 = vmax.f32 %v3419_v37, 0.0 }
  0x4a   :  { %v179_v30 = vmax.f32 %v3488_v31, 0.0  ;;  %1275 = vmatpush1.bf16.msra.mxu1 %v3648_v59  ;;  %v195_v56 = vmax.f32 %v3491_v55, 0.0  ;;  %v3655_v36 = vld [vmem:[#allocation7 + $0x274] ss:$24 sps:$4 sm:$0xff]   ;;  %v216_v24 = vmax.f32 %v3435_v47, 0.0  ;;  %v219_v48 = vmax.f32 %v3483_v15, 0.0 }
  0x4b   :  { %3611 = vmatpush3.bf16.msra.mxu0 %v3638_v3  ;;  %v175_v3 = vmax.f32 %v3424_v42, 0.0  ;;  %v193_v42 = vmax.f32 %v3459_v62, 0.0  ;;  %1276 = vmatprep.subr.bf16.mxu1 %v3649_v22  ;;  %v4308_v43 = vadd.f32 %v194_v60, %v178_v41  ;;  %v218_v41 = vmax.f32 %v3467_v2, 0.0 }
  0x4c   :  { %3612 = vmatprep.subr.bf16.mxu0 %v3639_v28  ;;  %v4310_v54 = vadd.f32 %v195_v56, %v179_v30  ;;  %v4699_v30 = vunpack.c.l.bf16 %v4242_v40  ;;  %v4702_v37 = vunpack.c.h.bf16 %v4212_v18  ;;  %v4703_v61 = vunpack.c.h.bf16 %v4222_v25 }
  0x4d   :  { %v4704_v47 = vunpack.c.h.bf16 %v4232_v33  ;;  %v4705_v2 = vunpack.c.h.bf16 %v4242_v40  ;;  %v4707_v33 = vunpack.c.l.bf16 %v4194_v5 }
  0x4e   :  { %1277 = vmatpush1.bf16.msra.mxu1 %v3654_v14  ;;  %v230_v56 = vmax.f32 %v4702_v37, 0.0  ;;  %v231_v62 = vmax.f32 %v4703_v61, 0.0 }
  0x4f   :  { %3613 = vmatpush3.bf16.msra.mxu0 %v3639_v28  ;;  %v172_v28 = vmax.f32 %v3376_v10, 0.0  ;;  %v190_v10 = vmax.f32 %v3411_v35, 0.0  ;;  %v4306_v35 = vadd.f32 %v193_v42, %v177_v38  ;;  %v217_v38 = vmax.f32 %v4699_v30, 0.0  ;;  %1278 = vmatprep.subr.bf16.mxu1 %v3655_v36  ;;  %v3661_v42 = vld [vmem:[#allocation7 + $0x244] ss:$24 sps:$4 sm:$0xff]  }
  0x50   :  { %3614 = vmatprep.subr.bf16.mxu0 %v3640_v53  ;;  %v233_v15 = vmax.f32 %v4705_v2, 0.0  ;;  %v239_v18 = vadd.f32 %v231_v62, %v215_v21  ;;  %v252_v40 = vmax.f32 %v4707_v33, 0.0  ;;  %v4715_v2 = vunpack.c.h.bf16 %v4196_v6 }
  0x51   :  { %v4296_v50 = vadd.f32 %v188_v17, %v172_v28  ;;  %v4300_v31 = vadd.f32 %v190_v10, %v174_v9  ;;  %v212_v17 = vmax.f32 %v3371_v7, 0.0  ;;  %v213_v9 = vmax.f32 %v3387_v16, 0.0  ;;  %v3647_v7 = vld [vmem:[#allocation7 + $0x2dc] ss:$24 sps:$4 sm:$0xff]   ;;  %v3660_v10 = vld [vmem:[#allocation7 + $0x270] ss:$24 sps:$4 sm:$0xff]  }
  0x52   :  { %v4700_v16 = vunpack.c.h.bf16 %v4192_v4  ;;  %v4706_v28 = vunpack.c.h.bf16 %v4256_v51  ;;  %v235_v4 = vmax.f32 %v3484_v63, 0.0  ;;  %v241_v25 = vadd.f32 %v233_v15, %v217_v38  ;;  %1279 = vmatpush1.bf16.msra.mxu1 %v3660_v10 }
  0x53   :  { %3615 = vmatpush3.bf16.msra.mxu0 %v3640_v53  ;;  %v4302_v53 = vadd.f32 %v191_v8, %v175_v3  ;;  %v214_v8 = vmax.f32 %v3403_v29, 0.0  ;;  %v4701_v29 = vunpack.c.h.bf16 %v4202_v11  ;;  %v232_v3 = vmax.f32 %v4704_v47, 0.0  ;;  %1280 = vmatprep.subr.bf16.mxu1 %v3661_v42 }
  0x54   :  { %3616 = vmatprep.subr.bf16.mxu0 %v3641_v49  ;;  %v234_v59 = vmax.f32 %v4706_v28, 0.0  ;;  %v243_v36 = vadd.f32 %v235_v4, %v219_v48  ;;  %v4708_v51 = vunpack.c.l.bf16 %v4204_v12  ;;  %v4709_v63 = vunpack.c.l.bf16 %v4214_v19 }
  0x55   :  { %v229_v55 = vmax.f32 %v4701_v29, 0.0  ;;  %v238_v32 = vadd.f32 %v230_v56, %v214_v8  ;;  %v240_v60 = vadd.f32 %v232_v3, %v216_v24  ;;  %v4711_v8 = vunpack.c.l.bf16 %v4234_v34 }
  0x56   :  { %v242_v14 = vadd.f32 %v234_v59, %v218_v41  ;;  %v253_v30 = vmax.f32 %v4708_v51, 0.0  ;;  %v4712_v24 = vunpack.c.l.bf16 %v4248_v45  ;;  %v4713_v41 = vunpack.c.l.bf16 %v4258_v52 }
  0x57   :  { %3617 = vmatpush3.bf16.msra.mxu0 %v3641_v49  ;;  %v228_v49 = vmax.f32 %v4700_v16, 0.0  ;;  %v237_v22 = vadd.f32 %v229_v55, %v213_v9  ;;  %v256_v21 = vmax.f32 %v4711_v8, 0.0  ;;  %v4714_v48 = vunpack.c.l.bf16 %v4272_v0 }
  0x58   :  { %3618 = vmatprep.subr.bf16.mxu0 %v3642_v57  ;;  %v257_v38 = vmax.f32 %v4712_v24, 0.0  ;;  %v258_v5 = vmax.f32 %v4713_v41, 0.0  ;;  %v284_v15 = vmax.f32 %v4715_v2, 0.0  ;;  %v4716_v28 = vunpack.c.h.bf16 %v4206_v13 }
  0x59   :  { %v236_v11 = vadd.f32 %v228_v49, %v212_v17  ;;  %v4710_v17 = vunpack.c.l.bf16 %v4224_v26  ;;  %v259_v12 = vmax.f32 %v4714_v48, 0.0  ;;  %v261_v16 = vadd.f32 %v253_v30, %v237_v22 }
  0x5a   :  { %v264_v29 = vadd.f32 %v256_v21, %v240_v60  ;;  %v265_v55 = vadd.f32 %v257_v38, %v241_v25  ;;  %v266_v37 = vadd.f32 %v258_v5, %v242_v14  ;;  %v285_v59 = vmax.f32 %v4716_v28, 0.0 }
  0x5b   :  { %3619 = vmatpush3.bf16.msra.mxu0 %v3642_v57  ;;  %v254_v57 = vmax.f32 %v4709_v63, 0.0  ;;  %v255_v9 = vmax.f32 %v4710_v17, 0.0  ;;  %v260_v19 = vadd.f32 %v252_v40, %v236_v11  ;;  %v267_v34 = vadd.f32 %v259_v12, %v243_v36 }
  0x5c   :  { %1315 = vmatprep.subr.bf16.mxu0 %v3647_v7  ;;  %v3666_v7 = vld [vmem:[#allocation7 + $0x240] ss:$24 sps:$4 sm:$0xff]   ;;  %v4358_v45 = vadd.f32 %v261_v16, %v4298_v44  ;;  %v4367_v61 = vadd.f32 %v264_v29, %v4304_v23  ;;  %v4370_v62 = vadd.f32 %v265_v55, %v4306_v35  ;;  %v4373_v47 = vadd.f32 %v266_v37, %v4308_v43 }
  0x5d   :  { %v262_v49 = vadd.f32 %v254_v57, %v238_v32  ;;  %v263_v26 = vadd.f32 %v255_v9, %v239_v18  ;;  %v4355_v56 = vadd.f32 %v260_v19, %v4296_v50  ;;  %1281 = vmatpush1.bf16.msra.mxu1 %v3666_v7  ;;  %v4376_v3 = vadd.f32 %v267_v34, %v4310_v54 }
  0x5e   :  { %v4717_v4 = vunpack.c.h.bf16 %v4216_v20  ;;  %v4718_v11 = vunpack.c.h.bf16 %v4226_v27  ;;  %v4719_v32 = vunpack.c.h.bf16 %v4240_v39  ;;  %v4720_v42 = vunpack.c.h.bf16 %v4250_v46 }
  0x5f   :  { %v4361_v52 = vadd.f32 %v262_v49, %v4300_v31  ;;  %v4364_v0 = vadd.f32 %v263_v26, %v4302_v53  ;;  %v4721_v25 = vunpack.c.h.bf16 %v4264_v58  ;;  %v4722_v6 = vunpack.c.h.bf16 %v4274_v1 }
  0x60   :  { %v286_v10 = vmax.f32 %v4717_v4, 0.0  ;;  %v287_v22 = vmax.f32 %v4718_v11, 0.0  ;;  %v288_v18 = vmax.f32 %v4719_v32, 0.0  ;;  %v289_v60 = vmax.f32 %v4720_v42, 0.0 }
  0x61   :  { %v290_v14 = vmax.f32 %v4721_v25, 0.0  ;;  %v291_v36 = vmax.f32 %v4722_v6, 0.0  ;;  %v4395_v13 = vadd.f32 %v284_v15, %v4296_v50  ;;  %v4398_v20 = vadd.f32 %v285_v59, %v4298_v44 }
  0x62   :  { %v4401_v27 = vadd.f32 %v286_v10, %v4300_v31  ;;  %v4404_v39 = vadd.f32 %v287_v22, %v4302_v53  ;;  %v4407_v46 = vadd.f32 %v288_v18, %v4304_v23  ;;  %v4410_v58 = vadd.f32 %v289_v60, %v4306_v35 }
  0x63   :  { %v4413_v1 = vadd.f32 %v290_v14, %v4308_v43  ;;  %v4416_v50 = vadd.f32 %v291_v36, %v4310_v54  ;;  %v349_v44 = vsel %vm348_vm0, %v4355_v56, 0.0  ;;  %v356_v31 = vsel %vm348_vm0, %v4358_v45, 0.0 }
  0x64   :  { %v363_v53 = vsel %vm348_vm0, %v4361_v52, 0.0  ;;  %v370_v23 = vsel %vm348_vm0, %v4364_v0, 0.0  ;;  %v350_v35 = vrot.slane %v349_v44, 4  ;;  %v357_v33 = vrot.slane %v356_v31, 4 }
  0x65   :  { %v364_v40 = vrot.slane %v363_v53, 4  ;;  %v371_v43 = vrot.slane %v370_v23, 4  ;;  %v377_v54 = vsel %vm348_vm0, %v4367_v61, 0.0  ;;  %v384_v51 = vsel %vm348_vm0, %v4370_v62, 0.0 }
  0x66   :  { %v391_v30 = vsel %vm348_vm0, %v4373_v47, 0.0  ;;  %v398_v63 = vsel %vm348_vm0, %v4376_v3, 0.0  ;;  %v351_v57 = vadd.f32 %v350_v35, %v349_v44  ;;  %v358_v17 = vadd.f32 %v357_v33, %v356_v31 }
  0x67   :  { %v365_v9 = vadd.f32 %v364_v40, %v363_v53  ;;  %v372_v8 = vadd.f32 %v371_v43, %v370_v23  ;;  %v378_v21 = vrot.slane %v377_v54, 4  ;;  %v385_v24 = vrot.slane %v384_v51, 4 }
  0x68   :  { %v392_v38 = vrot.slane %v391_v30, 4  ;;  %v399_v41 = vrot.slane %v398_v63, 4  ;;  %v352_v5 = vrot.slane %v351_v57, 2  ;;  %v359_v48 = vrot.slane %v358_v17, 2 }
  0x69   :  { %v366_v12 = vrot.slane %v365_v9, 2  ;;  %v373_v7 = vrot.slane %v372_v8, 2  ;;  %v379_v19 = vadd.f32 %v378_v21, %v377_v54  ;;  %v386_v16 = vadd.f32 %v385_v24, %v384_v51 }
  0x6a   :  { %v393_v49 = vadd.f32 %v392_v38, %v391_v30  ;;  %v400_v26 = vadd.f32 %v399_v41, %v398_v63  ;;  %v353_v29 = vadd.f32 %v352_v5, %v351_v57  ;;  %v360_v55 = vadd.f32 %v359_v48, %v358_v17 }
  0x6b   :  { %v367_v37 = vadd.f32 %v366_v12, %v365_v9  ;;  %v374_v34 = vadd.f32 %v373_v7, %v372_v8  ;;  %v380_v2 = vrot.slane %v379_v19, 2  ;;  %v387_v15 = vrot.slane %v386_v16, 2 }
  0x6c   :  { %v394_v28 = vrot.slane %v393_v49, 2  ;;  %v401_v59 = vrot.slane %v400_v26, 2  ;;  %v354_v4 = vrot.slane %v353_v29, 1  ;;  %v361_v10 = vrot.slane %v360_v55, 1 }
  0x6d   :  { %v368_v11 = vrot.slane %v367_v37, 1  ;;  %v375_v22 = vrot.slane %v374_v34, 1  ;;  %v381_v32 = vadd.f32 %v380_v2, %v379_v19  ;;  %v388_v18 = vadd.f32 %v387_v15, %v386_v16 }
  0x6e   :  { %v395_v42 = vadd.f32 %v394_v28, %v393_v49  ;;  %v402_v60 = vadd.f32 %v401_v59, %v400_v26  ;;  %v4434_v25 = vadd.f32 %v354_v4, %v353_v29  ;;  %v4436_v14 = vadd.f32 %v361_v10, %v360_v55 }
  0x6f   :  { %v4438_v6 = vadd.f32 %v368_v11, %v367_v37  ;;  %v4440_v36 = vadd.f32 %v375_v22, %v374_v34  ;;  %v382_v44 = vrot.slane %v381_v32, 1  ;;  %v389_v31 = vrot.slane %v388_v18, 1 }
  0x70   :  { %v396_v53 = vrot.slane %v395_v42, 1  ;;  %v403_v23 = vrot.slane %v402_v60, 1  ;;  %v413_v35 = vrot.slane %v4355_v56, 3  ;;  %v414_v33 = vrot.slane %v4358_v45, 3 }
  0x71   :  { %v415_v40 = vrot.slane %v4361_v52, 3  ;;  %v416_v43 = vrot.slane %v4364_v0, 3  ;;  %v4446_v54 = vadd.f32 %v382_v44, %v381_v32  ;;  %v4448_v51 = vadd.f32 %v389_v31, %v388_v18  ;;  %v4466_v44 = vld [vmem:[#allocation2 + $0x18] sm:$0xff]  }
  0x72   :  { %v4450_v30 = vadd.f32 %v396_v53, %v395_v42  ;;  %v4452_v63 = vadd.f32 %v403_v23, %v402_v60  ;;  %v417_v57 = vrot.slane %v4367_v61, 3  ;;  %v418_v17 = vrot.slane %v4370_v62, 3 }
  0x73   :  { %v419_v56 = vrot.slane %v4373_v47, 3  ;;  %v420_v45 = vrot.slane %v4376_v3, 3  ;;  %v429_v52 = vsel %vm348_vm0, %v413_v35, 0.0  ;;  %v436_v0 = vsel %vm348_vm0, %v414_v33, 0.0 }
  0x74   :  { %v443_v9 = vsel %vm348_vm0, %v415_v40, 0.0  ;;  %v450_v8 = vsel %vm348_vm0, %v416_v43, 0.0  ;;  %v430_v21 = vrot.slane %v429_v52, 4  ;;  %v437_v24 = vrot.slane %v436_v0, 4 }
  0x75   :  { %v444_v38 = vrot.slane %v443_v9, 4  ;;  %v451_v41 = vrot.slane %v450_v8, 4  ;;  %v457_v61 = vsel %vm348_vm0, %v417_v57, 0.0  ;;  %v464_v62 = vsel %vm348_vm0, %v418_v17, 0.0  ;;  %v4468_v17 = vld [vmem:[#allocation2 + $0x38] sm:$0xff]  }
  0x76   :  { %v471_v47 = vsel %vm348_vm0, %v419_v56, 0.0  ;;  %v478_v3 = vsel %vm348_vm0, %v420_v45, 0.0  ;;  %v431_v5 = vadd.f32 %v430_v21, %v429_v52  ;;  %v438_v48 = vadd.f32 %v437_v24, %v436_v0 }
  0x77   :  { %v445_v12 = vadd.f32 %v444_v38, %v443_v9  ;;  %v452_v7 = vadd.f32 %v451_v41, %v450_v8  ;;  %v458_v19 = vrot.slane %v457_v61, 4  ;;  %v465_v16 = vrot.slane %v464_v62, 4  ;;  %v4470_v9 = vld [vmem:[#allocation2 + $0x58] sm:$0xff]  }
  0x78   :  { %v472_v49 = vrot.slane %v471_v47, 4  ;;  %v479_v26 = vrot.slane %v478_v3, 4  ;;  %v432_v29 = vrot.slane %v431_v5, 2  ;;  %v439_v55 = vrot.slane %v438_v48, 2  ;;  %v3511_v41 = vld [vmem:[#allocation2 + $0x78] sm:$0xff]  }
  0x79   :  { %v446_v37 = vrot.slane %v445_v12, 2  ;;  %v453_v34 = vrot.slane %v452_v7, 2  ;;  %v459_v2 = vadd.f32 %v458_v19, %v457_v61  ;;  %v466_v15 = vadd.f32 %v465_v16, %v464_v62  ;;  %v3519_v16 = vld [vmem:[#allocation2 + $0xb8] sm:$0xff]  }
  0x7a   :  { %v473_v28 = vadd.f32 %v472_v49, %v471_v47  ;;  %v480_v59 = vadd.f32 %v479_v26, %v478_v3  ;;  %v433_v4 = vadd.f32 %v432_v29, %v431_v5  ;;  %v440_v10 = vadd.f32 %v439_v55, %v438_v48  ;;  %v3515_v5 = vld [vmem:[#allocation2 + $0x98] sm:$0xff]  }
  0x7b   :  { %v447_v11 = vadd.f32 %v446_v37, %v445_v12  ;;  %v454_v22 = vadd.f32 %v453_v34, %v452_v7  ;;  %v460_v32 = vrot.slane %v459_v2, 2  ;;  %v467_v18 = vrot.slane %v466_v15, 2 }
  0x7c   :  { %v474_v42 = vrot.slane %v473_v28, 2  ;;  %v481_v60 = vrot.slane %v480_v59, 2  ;;  %v434_v31 = vrot.slane %v433_v4, 1  ;;  %v441_v53 = vrot.slane %v440_v10, 1 }
  0x7d   :  { %v448_v23 = vrot.slane %v447_v11, 1  ;;  %v455_v35 = vrot.slane %v454_v22, 1  ;;  %v461_v33 = vadd.f32 %v460_v32, %v459_v2  ;;  %v468_v40 = vadd.f32 %v467_v18, %v466_v15  ;;  %v3527_v15 = vld [vmem:[#allocation2 + $0xf8] sm:$0xff]  }
  0x7e   :  { %v475_v43 = vadd.f32 %v474_v42, %v473_v28  ;;  %v482_v57 = vadd.f32 %v481_v60, %v480_v59  ;;  %v435_v56 = vadd.f32 %v434_v31, %v433_v4  ;;  %v442_v45 = vadd.f32 %v441_v53, %v440_v10 }
  0x7f   :  { %v449_v52 = vadd.f32 %v448_v23, %v447_v11  ;;  %v456_v0 = vadd.f32 %v455_v35, %v454_v22  ;;  %v462_v8 = vrot.slane %v461_v33, 1  ;;  %v469_v21 = vrot.slane %v468_v40, 1 }
  0x80   :  { %v476_v24 = vrot.slane %v475_v43, 1  ;;  %v483_v38 = vrot.slane %v482_v57, 1  ;;  %v630_v61 = vsel %vm629_vm1, %v4436_v14, %v4434_v25  ;;  %v652_v62 = vsel %vm629_vm1, %v442_v45, %v435_v56  ;;  %v3523_v14 = vld [vmem:[#allocation2 + $0xd8] sm:$0xff]  }
  0x81   :  { %v3383_v47 = vunpack.c.l.bf16 %v4466_v44  ;;  %v3384_v3 = vunpack.c.h.bf16 %v4466_v44  ;;  %v463_v48 = vadd.f32 %v462_v8, %v461_v33  ;;  %v470_v12 = vadd.f32 %v469_v21, %v468_v40 }
  0x82   :  { %v477_v7 = vadd.f32 %v476_v24, %v475_v43  ;;  %v484_v19 = vadd.f32 %v483_v38, %v482_v57  ;;  %v632_v49 = vsel %vm631_vm2, %v4438_v6, %v630_v61  ;;  %v653_v26 = vsel %vm631_vm2, %v449_v52, %v652_v62 }
  0x83   :  { %v3399_v29 = vunpack.c.l.bf16 %v4468_v17  ;;  %v3400_v25 = vunpack.c.h.bf16 %v4468_v17  ;;  %v634_v55 = vsel %vm633_vm3, %v4440_v36, %v632_v49  ;;  %v654_v37 = vsel %vm633_vm3, %v456_v0, %v653_v26 }
  0x84   :  { %v3415_v34 = vunpack.c.l.bf16 %v4470_v9  ;;  %v3416_v2 = vunpack.c.h.bf16 %v4470_v9  ;;  %v636_v6 = vsel %vm635_vm4, %v4446_v54, %v634_v55  ;;  %v655_v28 = vsel %vm635_vm4, %v463_v48, %v654_v37 }
  0x85   :  { %v3431_v59 = vunpack.c.l.bf16 %v3511_v41  ;;  %v3432_v4 = vunpack.c.h.bf16 %v3511_v41  ;;  %v638_v10 = vsel %vm637_vm5, %v4448_v51, %v636_v6  ;;  %v656_v11 = vsel %vm637_vm5, %v470_v12, %v655_v28 }
  0x86   :  { %v3447_v36 = vunpack.c.l.bf16 %v3515_v5  ;;  %v3448_v22 = vunpack.c.h.bf16 %v3515_v5  ;;  %v640_v32 = vsel %vm639_vm6, %v4450_v30, %v638_v10  ;;  %v657_v18 = vsel %vm639_vm6, %v477_v7, %v656_v11 }
  0x87   :  { %v3463_v42 = vunpack.c.l.bf16 %v3519_v16  ;;  %v3464_v60 = vunpack.c.h.bf16 %v3519_v16  ;;  %v642_v54 = vsel %vm641_vm7, %v4452_v63, %v640_v32  ;;  %v658_v44 = vsel %vm641_vm7, %v484_v19, %v657_v18 }
  0x88   :  { %v3479_v31 = vunpack.c.l.bf16 %v3523_v14  ;;  %v3480_v53 = vunpack.c.h.bf16 %v3523_v14  ;;  %v692_v23 = vmul.f32 0.04, %v642_v54  ;;  %v693_v51 = vmul.f32 0.04, %v658_v44 }
  0x89   :  { %v3495_v35 = vunpack.c.l.bf16 %v3527_v15  ;;  %v3496_v33 = vunpack.c.h.bf16 %v3527_v15  ;;  %v308_v40 = vmax.f32 %v3383_v47, 0.0  ;;  %v309_v43 = vmax.f32 %v3399_v29, 0.0 }
  0x8a   :  { %v310_v57 = vmax.f32 %v3415_v34, 0.0  ;;  %v311_v17 = vmax.f32 %v3431_v59, 0.0  ;;  %v696_v30 = vpack.c.bf16 %v693_v51, %v692_v23  ;;  %v312_v56 = vmax.f32 %v3447_v36, 0.0 }
  0x8b   :  { %v313_v45 = vmax.f32 %v3463_v42, 0.0  ;;  %v314_v52 = vmax.f32 %v3479_v31, 0.0  ;;  %v315_v0 = vmax.f32 %v3495_v35, 0.0  ;;  %v316_v9 = vadd.f32 %v308_v40, %v4395_v13 }
  0x8c   :  { %v317_v63 = vadd.f32 %v309_v43, %v4398_v20  ;;  %v318_v8 = vadd.f32 %v310_v57, %v4401_v27  ;;  %3620 = vmatprep.mubr.bf16.mxu0 %v696_v30  ;;  %v319_v21 = vadd.f32 %v311_v17, %v4404_v39  ;;  %v320_v24 = vadd.f32 %v312_v56, %v4407_v46 }
  0x8d   :  { %v321_v38 = vadd.f32 %v313_v45, %v4410_v58  ;;  %v322_v41 = vadd.f32 %v314_v52, %v4413_v1  ;;  %v323_v61 = vadd.f32 %v315_v0, %v4416_v50  ;;  %v332_v62 = vmax.f32 %v3384_v3, 0.0 }
  0x8e   :  { %v333_v47 = vmax.f32 %v3400_v25, 0.0  ;;  %v334_v5 = vmax.f32 %v3416_v2, 0.0  ;;  %v335_v48 = vmax.f32 %v3432_v4, 0.0  ;;  %v336_v13 = vmax.f32 %v3448_v22, 0.0 }
  0x8f   :  { %v337_v12 = vmax.f32 %v3464_v60, 0.0  ;;  %v338_v20 = vmax.f32 %v3480_v53, 0.0  ;;  %v339_v7 = vmax.f32 %v3496_v33, 0.0  ;;  %v4508_v27 = vadd.f32 %v332_v62, %v316_v9 }
  0x90   :  { %v4510_v19 = vadd.f32 %v333_v47, %v317_v63  ;;  %v4512_v39 = vadd.f32 %v334_v5, %v318_v8  ;;  %v4514_v46 = vadd.f32 %v335_v48, %v319_v21  ;;  %v4516_v58 = vadd.f32 %v336_v13, %v320_v24 }
  0x91   :  { %v4518_v1 = vadd.f32 %v337_v12, %v321_v38  ;;  %v4520_v50 = vadd.f32 %v338_v20, %v322_v41  ;;  %v4522_v3 = vadd.f32 %v339_v7, %v323_v61  ;;  %v485_v16 = vsel %vm348_vm0, %v4508_v27, 0.0 }
  0x92   :  { %v492_v49 = vsel %vm348_vm0, %v4510_v19, 0.0  ;;  %v499_v26 = vsel %vm348_vm0, %v4512_v39, 0.0  ;;  %v486_v29 = vrot.slane %v485_v16, 4  ;;  %v506_v55 = vsel %vm348_vm0, %v4514_v46, 0.0 }
  0x93   :  { %v493_v25 = vrot.slane %v492_v49, 4  ;;  %v500_v14 = vrot.slane %v499_v26, 4  ;;  %v507_v37 = vrot.slane %v506_v55, 4  ;;  %v513_v34 = vsel %vm348_vm0, %v4516_v58, 0.0 }
  0x94   :  { %v520_v2 = vsel %vm348_vm0, %v4518_v1, 0.0  ;;  %v527_v15 = vsel %vm348_vm0, %v4520_v50, 0.0  ;;  %v487_v6 = vadd.f32 %v486_v29, %v485_v16  ;;  %v514_v4 = vrot.slane %v513_v34, 4 }
  0x95   :  { %v494_v28 = vadd.f32 %v493_v25, %v492_v49  ;;  %v501_v59 = vadd.f32 %v500_v14, %v499_v26  ;;  %v508_v10 = vadd.f32 %v507_v37, %v506_v55  ;;  %v521_v11 = vrot.slane %v520_v2, 4 }
  0x96   :  { %v528_v36 = vrot.slane %v527_v15, 4  ;;  %v534_v22 = vsel %vm348_vm0, %v4522_v3, 0.0  ;;  %v488_v32 = vrot.slane %v487_v6, 2  ;;  %v515_v60 = vadd.f32 %v514_v4, %v513_v34 }
  0x97   :  { %v495_v18 = vrot.slane %v494_v28, 2  ;;  %v502_v42 = vrot.slane %v501_v59, 2  ;;  %v509_v54 = vrot.slane %v508_v10, 2  ;;  %v522_v44 = vadd.f32 %v521_v11, %v520_v2 }
  0x98   :  { %v529_v31 = vadd.f32 %v528_v36, %v527_v15  ;;  %v535_v53 = vrot.slane %v534_v22, 4  ;;  %v489_v23 = vadd.f32 %v488_v32, %v487_v6  ;;  %v516_v33 = vrot.slane %v515_v60, 2 }
  0x99   :  { %v496_v51 = vadd.f32 %v495_v18, %v494_v28  ;;  %v503_v35 = vadd.f32 %v502_v42, %v501_v59  ;;  %v510_v40 = vadd.f32 %v509_v54, %v508_v10  ;;  %v523_v43 = vrot.slane %v522_v44, 2 }
  0x9a   :  { %v530_v57 = vrot.slane %v529_v31, 2  ;;  %v536_v17 = vadd.f32 %v535_v53, %v534_v22  ;;  %v490_v30 = vrot.slane %v489_v23, 1  ;;  %v517_v52 = vadd.f32 %v516_v33, %v515_v60 }
  0x9b   :  { %v497_v56 = vrot.slane %v496_v51, 1  ;;  %v504_v45 = vrot.slane %v503_v35, 1  ;;  %v511_v0 = vrot.slane %v510_v40, 1  ;;  %v4540_v9 = vadd.f32 %v523_v43, %v522_v44 }
  0x9c   :  { %v4542_v63 = vadd.f32 %v530_v57, %v529_v31  ;;  %v537_v8 = vrot.slane %v536_v17, 2  ;;  %v518_v21 = vrot.slane %v517_v52, 1  ;;  %v4544_v24 = vadd.f32 %v490_v30, %v489_v23 }
  0x9d   :  { %v4546_v38 = vadd.f32 %v497_v56, %v496_v51  ;;  %v4548_v41 = vadd.f32 %v504_v45, %v503_v35  ;;  %v525_v62 = vrot.slane %v4540_v9, 1  ;;  %v549_v47 = vrot.slane %v4508_v27, 3 }
  0x9e   :  { %v4550_v61 = vadd.f32 %v537_v8, %v536_v17  ;;  %v550_v5 = vrot.slane %v4510_v19, 3  ;;  %v551_v48 = vrot.slane %v4512_v39, 3  ;;  %v4556_v13 = vadd.f32 %v511_v0, %v510_v40 }
  0x9f   :  { %v4558_v12 = vadd.f32 %v518_v21, %v517_v52  ;;  %v532_v20 = vrot.slane %v4542_v63, 1  ;;  %v552_v7 = vrot.slane %v4514_v46, 3  ;;  %v553_v49 = vrot.slane %v4516_v58, 3 }
  0xa0   :  { %v539_v16 = vrot.slane %v4550_v61, 1  ;;  %v554_v26 = vrot.slane %v4518_v1, 3  ;;  %v555_v27 = vrot.slane %v4520_v50, 3  ;;  %v556_v19 = vrot.slane %v4522_v3, 3 }
  0xa1   :  { %v565_v39 = vsel %vm348_vm0, %v549_v47, 0.0  ;;  %v572_v29 = vsel %vm348_vm0, %v550_v5, 0.0  ;;  %v579_v25 = vsel %vm348_vm0, %v551_v48, 0.0  ;;  %v586_v46 = vsel %vm348_vm0, %v552_v7, 0.0 }
  0xa2   :  { %v566_v14 = vrot.slane %v565_v39, 4  ;;  %v573_v55 = vrot.slane %v572_v29, 4  ;;  %v580_v37 = vrot.slane %v579_v25, 4  ;;  %v587_v34 = vrot.slane %v586_v46, 4 }
  0xa3   :  { %v593_v58 = vsel %vm348_vm0, %v553_v49, 0.0  ;;  %v600_v1 = vsel %vm348_vm0, %v554_v26, 0.0  ;;  %v607_v50 = vsel %vm348_vm0, %v555_v27, 0.0  ;;  %v614_v10 = vsel %vm348_vm0, %v556_v19, 0.0 }
  0xa4   :  { %v567_v2 = vadd.f32 %v566_v14, %v565_v39  ;;  %v574_v3 = vadd.f32 %v573_v55, %v572_v29  ;;  %v581_v15 = vadd.f32 %v580_v37, %v579_v25  ;;  %v594_v6 = vrot.slane %v593_v58, 4 }
  0xa5   :  { %v588_v28 = vadd.f32 %v587_v34, %v586_v46  ;;  %v601_v59 = vrot.slane %v600_v1, 4  ;;  %v608_v4 = vrot.slane %v607_v50, 4  ;;  %v615_v54 = vrot.slane %v614_v10, 4 }
  0xa6   :  { %v568_v11 = vrot.slane %v567_v2, 2  ;;  %v575_v36 = vrot.slane %v574_v3, 2  ;;  %v582_v22 = vrot.slane %v581_v15, 2  ;;  %v595_v32 = vadd.f32 %v594_v6, %v593_v58  ;;  %v3651_v6 = vld [vmem:[#allocation7 + $0x2a8] ss:$24 sps:$4 sm:$0xff]  }
  0xa7   :  { %v589_v18 = vrot.slane %v588_v28, 2  ;;  %v602_v42 = vadd.f32 %v601_v59, %v600_v1  ;;  %v609_v60 = vadd.f32 %v608_v4, %v607_v50  ;;  %v616_v40 = vadd.f32 %v615_v54, %v614_v10  ;;  %v3657_v59 = vld [vmem:[#allocation7 + $0x278] ss:$24 sps:$4 sm:$0xff]   ;;  %v3665_v4 = vld [vmem:[#allocation7 + $0x24c] ss:$24 sps:$4 sm:$0xff]  }
  0xa8   :  { %v569_v44 = vadd.f32 %v568_v11, %v567_v2  ;;  %v576_v31 = vadd.f32 %v575_v36, %v574_v3  ;;  %v583_v53 = vadd.f32 %v582_v22, %v581_v15  ;;  %v596_v23 = vrot.slane %v595_v32, 2  ;;  %v3645_v2 = vld [vmem:[#allocation7 + $0x2d8] ss:$24 sps:$4 sm:$0xff]   ;;  %v3663_v10 = vld [vmem:[#allocation7 + $0x248] ss:$24 sps:$4 sm:$0xff]  }
  0xa9   :  { %v590_v51 = vadd.f32 %v589_v18, %v588_v28  ;;  %v603_v35 = vrot.slane %v602_v42, 2  ;;  %v610_v33 = vrot.slane %v609_v60, 2  ;;  %v617_v0 = vrot.slane %v616_v40, 2  ;;  %v3659_v28 = vld [vmem:[#allocation7 + $0x27c] ss:$24 sps:$4 sm:$0xff]  }
  0xaa   :  { %v570_v43 = vrot.slane %v569_v44, 1  ;;  %v577_v57 = vrot.slane %v576_v31, 1  ;;  %v584_v17 = vrot.slane %v583_v53, 1  ;;  %v597_v30 = vadd.f32 %v596_v23, %v595_v32  ;;  %v3667_v11 = vld [vmem:[#allocation7 + $0x214] ss:$24 sps:$4 sm:$0xff]  }
  0xab   :  { %v591_v56 = vrot.slane %v590_v51, 1  ;;  %v604_v45 = vadd.f32 %v603_v35, %v602_v42  ;;  %v611_v52 = vadd.f32 %v610_v33, %v609_v60  ;;  %v618_v26 = vadd.f32 %v617_v0, %v616_v40  ;;  %v3671_v36 = vld [vmem:[#allocation7 + $0x21c] ss:$24 sps:$4 sm:$0xff]   ;;  %v3669_v22 = vld [vmem:[#allocation7 + $0x218] ss:$24 sps:$4 sm:$0xff]   ;;  %1282 = vmatprep.subr.bf16.mxu1 %v3667_v11 }
  0xac   :  { %v571_v8 = vadd.f32 %v570_v43, %v569_v44  ;;  %v578_v21 = vadd.f32 %v577_v57, %v576_v31  ;;  %v585_v47 = vadd.f32 %v584_v17, %v583_v53  ;;  %v598_v5 = vrot.slane %v597_v30, 1  ;;  %v3672_v32 = vld [vmem:[#allocation7 + $0x210] ss:$24 sps:$4 sm:$0xff]   ;;  %v3673_v18 = vld [vmem:[#allocation7 + $0x1e4] ss:$24 sps:$4 sm:$0xff]  }
  0xad   :  { %v592_v48 = vadd.f32 %v591_v56, %v590_v51  ;;  %v605_v7 = vrot.slane %v604_v45, 1  ;;  %v612_v49 = vrot.slane %v611_v52, 1  ;;  %v526_v27 = vadd.f32 %v525_v62, %v4540_v9  ;;  %1283 = vmatpush1.bf16.msra.mxu1 %v3672_v32  ;;  %v3677_v42 = vld [vmem:[#allocation7 + $0x1ec] ss:$24 sps:$4 sm:$0xff]   ;;  %v3675_v60 = vld [vmem:[#allocation7 + $0x1e8] ss:$24 sps:$4 sm:$0xff]  }
  0xae   :  { %v599_v19 = vadd.f32 %v598_v5, %v597_v30  ;;  %v668_v39 = vsel %vm629_vm1, %v4546_v38, %v4544_v24  ;;  %v684_v29 = vsel %vm629_vm1, %v578_v21, %v571_v8  ;;  %v533_v25 = vadd.f32 %v532_v20, %v4542_v63  ;;  %v3678_v54 = vld [vmem:[#allocation7 + $0x1e0] ss:$24 sps:$4 sm:$0xff]   ;;  %1284 = vmatprep.subr.bf16.mxu1 %v3673_v18  ;;  %v3679_v44 = vld [vmem:[#allocation7 + $0x1b4] ss:$24 sps:$4 sm:$0xff]   ;;  %v3684_v23 = vld [vmem:[#allocation7 + $0x1b0] ss:$24 sps:$4 sm:$0xff]  }
  0xaf   :  { %v606_v14 = vadd.f32 %v605_v7, %v604_v45  ;;  %v619_v55 = vrot.slane %v618_v26, 1  ;;  %v669_v37 = vsel %vm631_vm2, %v4548_v41, %v668_v39  ;;  %v540_v9 = vadd.f32 %v539_v16, %v4550_v61  ;;  %v3683_v31 = vld [vmem:[#allocation7 + $0x1bc] ss:$24 sps:$4 sm:$0xff]   ;;  %v3681_v53 = vld [vmem:[#allocation7 + $0x1b8] ss:$24 sps:$4 sm:$0xff]  }
  0xb0   :  { %v613_v62 = vadd.f32 %v612_v49, %v611_v52  ;;  %v670_v46 = vsel %vm633_vm3, %v4556_v13, %v669_v37  ;;  %v685_v24 = vsel %vm631_vm2, %v585_v47, %v684_v29  ;;  %v3685_v51 = vld [vmem:[#allocation7 + $0x184] ss:$24 sps:$4 sm:$0xff]   ;;  %v3687_v33 = vld [vmem:[#allocation7 + $0x188] ss:$24 sps:$4 sm:$0xff]   ;;  %v4116_v57 = vmov 0  }
  0xb1   :  { %v620_v38 = vadd.f32 %v619_v55, %v618_v26  ;;  %v671_v34 = vsel %vm635_vm4, %v4558_v12, %v670_v46  ;;  %v686_v63 = vsel %vm633_vm3, %v592_v48, %v685_v24  ;;  %v3653_v12 = vld [vmem:[#allocation7 + $0x2ac] ss:$24 sps:$4 sm:$0xff]   ;;  %1285 = vmatpush1.bf16.msra.mxu1 %v3678_v54  ;;  %v3690_v40 = vld [vmem:[#allocation7 + $0x180] ss:$24 sps:$4 sm:$0xff]   ;;  %1306 = vmatprep.mubr.bf16.mxu1 %v4116_v57  ;;  %v3733_v18 = vld [vmem:[#allocation7 + $0x190] ss:$24 sps:$4 sm:$0xff]  }
  0xb2   :  { %v672_v20 = vsel %vm637_vm5, %v526_v27, %v671_v34  ;;  %v687_v41 = vsel %vm635_vm4, %v599_v19, %v686_v63  ;;  %1286 = vmatprep.subr.bf16.mxu1 %v3679_v44  ;;  %v3689_v35 = vld [vmem:[#allocation7 + $0x18c] ss:$24 sps:$4 sm:$0xff]   ;;  %v3126_v30 = vld [vmem:[%s4691_s2] ss:$0 sm:$0xff]  ;;  %v3739_v44 = vld [vmem:[#allocation7 + $0x158] ss:$24 sps:$4 sm:$0xff]  }
  0xb3   :  { %v673_v58 = vsel %vm639_vm6, %v533_v25, %v672_v20  ;;  %v688_v61 = vsel %vm637_vm5, %v606_v14, %v687_v41  ;;  %v3693_v43 = vld [vmem:[#allocation7 + $0x2e4] ss:$24 sps:$4 sm:$0xff]   ;;  %v3696_v17 = vld [vmem:[#allocation7 + $0x154] ss:$24 sps:$4 sm:$0xff]   ;;  %v3127_v45 = vld [vmem:[%s4692_s3] ss:$0 sm:$0xff] }
  0xb4   :  { %v674_v16 = vsel %vm641_vm7, %v540_v9, %v673_v58  ;;  %v689_v13 = vsel %vm639_vm6, %v613_v62, %v688_v61  ;;  %v3691_v37 = vld [vmem:[#allocation7 + $0x2e0] ss:$24 sps:$4 sm:$0xff]   ;;  %v3694_v9 = vld [vmem:[#allocation7 + $0x150] ss:$24 sps:$4 sm:$0xff]   ;;  %v3699_v46 = vld [vmem:[#allocation7 + $0x2b4] ss:$24 sps:$4 sm:$0xff]  }
  0xb5   :  { %v690_v1 = vsel %vm641_vm7, %v620_v38, %v689_v13  ;;  %v694_v50 = vmul.f32 0.04, %v674_v16  ;;  %1287 = vmatpush1.bf16.msra.mxu1 %v3684_v23  ;;  %v3702_v24 = vld [vmem:[#allocation7 + $0x124] ss:$24 sps:$4 sm:$0xff]   ;;  %v3697_v38 = vld [vmem:[#allocation7 + $0x2b0] ss:$24 sps:$4 sm:$0xff]  }
  0xb6   :  { %v695_v3 = vmul.f32 0.04, %v690_v1  ;;  %1288 = vmatprep.subr.bf16.mxu1 %v3685_v51  ;;  %v3700_v34 = vld [vmem:[#allocation7 + $0x120] ss:$24 sps:$4 sm:$0xff]   ;;  %v3705_v63 = vld [vmem:[#allocation7 + $0x284] ss:$24 sps:$4 sm:$0xff]  }
  0xb7   :  { %v3708_v20 = vld [vmem:[#allocation7 + $0xf4] ss:$24 sps:$4 sm:$0xff]   ;;  %v3703_v41 = vld [vmem:[#allocation7 + $0x280] ss:$24 sps:$4 sm:$0xff]   ;;  %v3706_v58 = vld [vmem:[#allocation7 + $0xf0] ss:$24 sps:$4 sm:$0xff]  }
  0xb8   :  { %v697_v15 = vpack.c.bf16 %v695_v3, %v694_v50  ;;  %v3711_v61 = vld [vmem:[#allocation7 + $0x254] ss:$24 sps:$4 sm:$0xff]   ;;  %v3714_v16 = vld [vmem:[#allocation7 + $0xc4] ss:$24 sps:$4 sm:$0xff]   ;;  %v3709_v13 = vld [vmem:[#allocation7 + $0x250] ss:$24 sps:$4 sm:$0xff]  }
  0xb9   :  { %1289 = vmatpush1.bf16.msra.mxu1 %v3690_v40  ;;  %v3712_v1 = vld [vmem:[#allocation7 + $0xc0] ss:$24 sps:$4 sm:$0xff]   ;;  %v3717_v50 = vld [vmem:[#allocation7 + $0x224] ss:$24 sps:$4 sm:$0xff]   ;;  %v3750_v23 = vld [vmem:[#allocation7 + $0x134] ss:$24 sps:$4 sm:$0xff]  }
  0xba   :  { %3621 = vmatmul.mubr.bf16.vlgmr.msra.gmra.mxu0 %v697_v15  ;;  %1356 = vmatprep.subr.bf16.mxu1 %v3693_v43  ;;  %v3715_v3 = vld [vmem:[#allocation7 + $0x220] ss:$24 sps:$4 sm:$0xff]   ;;  %v3723_v15 = vld [vmem:[#allocation7 + $0x1f4] ss:$24 sps:$4 sm:$0xff]   ;;  %v3738_v32 = vld [vmem:[#allocation7 + $0x4] ss:$24 sps:$4 sm:$0xff]  }
  0xbb   :  { %1316 = vmatpush1.bf16.msra.mxu0 %v3645_v2  ;;  %1347 = vmatprep.mubr.bf16.mxu0 %v4116_v57  ;;  %v3720_v2 = vld [vmem:[#allocation7 + $0x94] ss:$24 sps:$4 sm:$0xff]   ;;  %v3727_v11 = vld [vmem:[#allocation7 + $0x1c0] ss:$24 sps:$4 sm:$0xff]   ;;  %v3744_v54 = vld [vmem:[#allocation7 + $0x164] ss:$24 sps:$4 sm:$0xff]  }
  0xbc   :  { %1317 = vmatprep.subr.bf16.mxu0 %v3653_v12  ;;  %v3718_v12 = vld [vmem:[#allocation7 + $0x90] ss:$24 sps:$4 sm:$0xff]   ;;  %v3756_v40 = vld [vmem:[#allocation7 + $0x104] ss:$24 sps:$4 sm:$0xff]  }
  0xbd   :  { %v3745_v51 = vld [vmem:[#allocation7 + $0x128] ss:$24 sps:$4 sm:$0xff]   ;;  %v3751_v43 = vld [vmem:[#allocation7 + $0xf8] ss:$24 sps:$4 sm:$0xff]  }
  0xbf   :  { %1318 = vmatpush1.bf16.msra.mxu0 %v3651_v6  ;;  %v3726_v6 = vld [vmem:[#allocation7 + $0x64] ss:$24 sps:$4 sm:$0xff]  }
  0xc0   :  { %1319 = vmatprep.subr.bf16.mxu0 %v3659_v28  ;;  %v3721_v28 = vld [vmem:[#allocation7 + $0x1f0] ss:$24 sps:$4 sm:$0xff]  }
  0xc3   :  { %1320 = vmatpush1.bf16.msra.mxu0 %v3657_v59  ;;  %v3724_v59 = vld [vmem:[#allocation7 + $0x60] ss:$24 sps:$4 sm:$0xff]  }
  0xc4   :  { %1321 = vmatprep.subr.bf16.mxu0 %v3665_v4  ;;  %v3729_v4 = vld [vmem:[#allocation7 + $0x1c4] ss:$24 sps:$4 sm:$0xff]  }
  0xc7   :  { %1322 = vmatpush1.bf16.msra.mxu0 %v3663_v10  ;;  %v3732_v10 = vld [vmem:[#allocation7 + $0x34] ss:$24 sps:$4 sm:$0xff]  }
  0xc8   :  { %1323 = vmatprep.subr.bf16.mxu0 %v3671_v36  ;;  %v3730_v36 = vld [vmem:[#allocation7 + $0x30] ss:$24 sps:$4 sm:$0xff]  }
  0xcb   :  { %1324 = vmatpush1.bf16.msra.mxu0 %v3669_v22  ;;  %v3735_v22 = vld [vmem:[#allocation7 + $0x194] ss:$24 sps:$4 sm:$0xff]  }
  0xcc   :  { %1325 = vmatprep.subr.bf16.mxu0 %v3677_v42  ;;  %v3736_v42 = vld [vmem:[#allocation7] ss:$24 sps:$4 sm:$0xff]  }
  0xcf   :  { %1326 = vmatpush1.bf16.msra.mxu0 %v3675_v60  ;;  %v3741_v60 = vld [vmem:[#allocation7 + $0x15c] ss:$24 sps:$4 sm:$0xff]  }
  0xd0   :  { %1327 = vmatprep.subr.bf16.mxu0 %v3683_v31  ;;  %v3742_v31 = vld [vmem:[#allocation7 + $0x160] ss:$24 sps:$4 sm:$0xff]  }
  0xd3   :  { %1328 = vmatpush1.bf16.msra.mxu0 %v3681_v53  ;;  %v3747_v53 = vld [vmem:[#allocation7 + $0x12c] ss:$24 sps:$4 sm:$0xff]  }
  0xd4   :  { %1329 = vmatprep.subr.bf16.mxu0 %v3689_v35  ;;  %v3748_v35 = vld [vmem:[#allocation7 + $0x130] ss:$24 sps:$4 sm:$0xff]  }
  0xd7   :  { %1330 = vmatpush1.bf16.msra.mxu0 %v3687_v33  ;;  %v3753_v33 = vld [vmem:[#allocation7 + $0xfc] ss:$24 sps:$4 sm:$0xff]  }
  0xd8   :  { %1637 = vmatprep.subr.bf16.mxu0 %v3696_v17  ;;  %v3754_v17 = vld [vmem:[#allocation7 + $0x100] ss:$24 sps:$4 sm:$0xff]  }
 0x17a   :  { %v3622_v56 = vpop.f32.mrf.mxu0 }
 0x17b   :  { %v820_v52 = vmul.f32 %v3622_v56, %v3126_v30  ;;  %v3762_v56 = vld [vmem:[#allocation7 + $0xd4] ss:$24 sps:$4 sm:$0xff]  }
 0x17c   :  { %v796_v0 = vpop.f32.mrf.mxu0 }
 0x17d   :  { %v831_v8 = vadd.f32 %v3127_v45, %v820_v52  ;;  %v818_v21 = vmul.f32 %v3126_v30, %v796_v0  ;;  %v3760_v52 = vld [vmem:[#allocation7 + $0xd0] ss:$24 sps:$4 sm:$0xff]   ;;  %v3765_v0 = vld [vmem:[#allocation7 + $0x9c] ss:$24 sps:$4 sm:$0xff]  }
 0x17e   :  { %v3623_v47 = vpop.f32.mrf.mxu0 }
 0x17f   :  { %v821_v5 = vmul.f32 %v3623_v47, %v3126_v30  ;;  %v829_v7 = vadd.f32 %v3127_v45, %v818_v21  ;;  %v835_v27 = vmax.f32 %v831_v8, 0.0  ;;  %v3768_v8 = vld [vmem:[#allocation7 + $0xa4] ss:$24 sps:$4 sm:$0xff]   ;;  %v3763_v21 = vld [vmem:[#allocation7 + $0x98] ss:$24 sps:$4 sm:$0xff]  }
 0x180   :  { %v799_v48 = vpop.f32.mrf.mxu0  ;;  %v3766_v47 = vld [vmem:[#allocation7 + $0xa0] ss:$24 sps:$4 sm:$0xff]  }
 0x181   :  { %v832_v49 = vadd.f32 %v3127_v45, %v821_v5  ;;  %v819_v26 = vmul.f32 %v3126_v30, %v799_v48  ;;  %v833_v29 = vmax.f32 %v829_v7, 0.0  ;;  %v3759_v30 = vld [vmem:[#allocation7 + $0xcc] ss:$24 sps:$4 sm:$0xff]   ;;  %v3769_v7 = vld [vmem:[#allocation7 + $0x68] ss:$24 sps:$4 sm:$0xff]  }
 0x182   :  { %v3771_v5 = vld [vmem:[#allocation7 + $0x6c] ss:$24 sps:$4 sm:$0xff]  }
 0x183   :  { %v836_v19 = vmax.f32 %v832_v49, 0.0  ;;  %v830_v39 = vadd.f32 %v3127_v45, %v819_v26  ;;  %v3757_v45 = vld [vmem:[#allocation7 + $0xc8] ss:$24 sps:$4 sm:$0xff]   ;;  %v3774_v48 = vld [vmem:[#allocation7 + $0x74] ss:$24 sps:$4 sm:$0xff]  }
 0x184   :  { %v3772_v49 = vld [vmem:[#allocation7 + $0x70] ss:$24 sps:$4 sm:$0xff]   ;;  %v3777_v26 = vld [vmem:[#allocation7 + $0x3c] ss:$24 sps:$4 sm:$0xff]  }
 0x185   :  { %v4611_v25 = vpack.c.bf16 %v836_v19, %v835_v27  ;;  %v834_v14 = vmax.f32 %v830_v39, 0.0  ;;  %v3780_v27 = vld [vmem:[#allocation7 + $0x44] ss:$24 sps:$4 sm:$0xff]   ;;  %v3775_v19 = vld [vmem:[#allocation7 + $0x38] ss:$24 sps:$4 sm:$0xff]  }
 0x186   :  { %v3778_v39 = vld [vmem:[#allocation7 + $0x40] ss:$24 sps:$4 sm:$0xff]  }
 0x187   :  { %v4613_v55 = vpack.c.bf16 %v834_v14, %v833_v29  ;;  %v3783_v29 = vld [vmem:[#allocation7 + $0xc] ss:$24 sps:$4 sm:$0xff]  }
 0x188   :  { %v3786_v14 = vld [vmem:[#allocation7 + $0x14] ss:$24 sps:$4 sm:$0xff]  }
 0x189   :  { %v4616_v62 = vrot.slane %v4613_v55, 4 }
 0x18b   :  { %1307 = vmatmul.mubr.bf16.vlgmr.msra.gmra.mxu1 %v4616_v62  ;;  %1348 = vmatmul.mubr.bf16.vlgmr.msra.gmra.mxu0 %v4616_v62 }
 0x18c   :  { %1357 = vmatpush1.bf16.msra.mxu1 %v3691_v37  ;;  %1638 = vmatpush1.bf16.msra.mxu0 %v3694_v9  ;;  %v3781_v37 = vld [vmem:[#allocation7 + $0x8] ss:$24 sps:$4 sm:$0xff]  }
 0x18d   :  { %1358 = vmatprep.subr.bf16.mxu1 %v3699_v46  ;;  %1639 = vmatprep.subr.bf16.mxu0 %v3702_v24  ;;  %v3784_v9 = vld [vmem:[#allocation7 + $0x10] ss:$24 sps:$4 sm:$0xff]   ;;  %v3792_v46 = vld [vmem:[#allocation7 + $0x45c] ss:$24 sps:$4 sm:$0xff]  }
 0x18e   :  { %1388 = vmatprep.mubr.bf16.mxu1 %v4116_v57  ;;  %1669 = vmatprep.mubr.bf16.mxu0 %v4116_v57  ;;  %v3787_v24 = vld [vmem:[#allocation7 + $0x450] ss:$24 sps:$4 sm:$0xff]  }
 0x190   :  { %1359 = vmatpush1.bf16.msra.mxu1 %v3697_v38  ;;  %1640 = vmatpush1.bf16.msra.mxu0 %v3700_v34  ;;  %v3790_v38 = vld [vmem:[#allocation7 + $0x458] ss:$24 sps:$4 sm:$0xff]   ;;  %v3795_v34 = vld [vmem:[#allocation7 + $0x424] ss:$24 sps:$4 sm:$0xff]  }
 0x191   :  { %1360 = vmatprep.subr.bf16.mxu1 %v3705_v63  ;;  %1641 = vmatprep.subr.bf16.mxu0 %v3708_v20  ;;  %v3798_v63 = vld [vmem:[#allocation7 + $0x42c] ss:$24 sps:$4 sm:$0xff]   ;;  %v3793_v20 = vld [vmem:[#allocation7 + $0x420] ss:$24 sps:$4 sm:$0xff]  }
 0x194   :  { %1361 = vmatpush1.bf16.msra.mxu1 %v3703_v41  ;;  %1642 = vmatpush1.bf16.msra.mxu0 %v3706_v58  ;;  %v3796_v41 = vld [vmem:[#allocation7 + $0x428] ss:$24 sps:$4 sm:$0xff]   ;;  %v3801_v58 = vld [vmem:[#allocation7 + $0x3f4] ss:$24 sps:$4 sm:$0xff]  }
 0x195   :  { %1362 = vmatprep.subr.bf16.mxu1 %v3711_v61  ;;  %1643 = vmatprep.subr.bf16.mxu0 %v3714_v16  ;;  %v3804_v61 = vld [vmem:[#allocation7 + $0x3fc] ss:$24 sps:$4 sm:$0xff]   ;;  %v3799_v16 = vld [vmem:[#allocation7 + $0x3f0] ss:$24 sps:$4 sm:$0xff]  }
 0x198   :  { %1363 = vmatpush1.bf16.msra.mxu1 %v3709_v13  ;;  %1644 = vmatpush1.bf16.msra.mxu0 %v3712_v1  ;;  %v3802_v13 = vld [vmem:[#allocation7 + $0x3f8] ss:$24 sps:$4 sm:$0xff]   ;;  %v3807_v1 = vld [vmem:[#allocation7 + $0x3c4] ss:$24 sps:$4 sm:$0xff]  }
 0x199   :  { %1364 = vmatprep.subr.bf16.mxu1 %v3717_v50  ;;  %1645 = vmatprep.subr.bf16.mxu0 %v3720_v2  ;;  %v3805_v50 = vld [vmem:[#allocation7 + $0x3c0] ss:$24 sps:$4 sm:$0xff]  }
 0x19a   :  { %v3808_v2 = vld [vmem:[#allocation7 + $0x3c8] ss:$24 sps:$4 sm:$0xff]  }
 0x19c   :  { %1365 = vmatpush1.bf16.msra.mxu1 %v3715_v3  ;;  %1646 = vmatpush1.bf16.msra.mxu0 %v3718_v12  ;;  %v3813_v3 = vld [vmem:[#allocation7 + $0x394] ss:$24 sps:$4 sm:$0xff]  }
 0x19d   :  { %1366 = vmatprep.subr.bf16.mxu1 %v3723_v15  ;;  %1647 = vmatprep.subr.bf16.mxu0 %v3726_v6  ;;  %v3816_v12 = vld [vmem:[#allocation7 + $0x39c] ss:$24 sps:$4 sm:$0xff]   ;;  %v3811_v15 = vld [vmem:[#allocation7 + $0x390] ss:$24 sps:$4 sm:$0xff]  }
 0x19e   :  { %v3814_v6 = vld [vmem:[#allocation7 + $0x398] ss:$24 sps:$4 sm:$0xff]  }
 0x1a0   :  { %1367 = vmatpush1.bf16.msra.mxu1 %v3721_v28  ;;  %1648 = vmatpush1.bf16.msra.mxu0 %v3724_v59  ;;  %v3819_v28 = vld [vmem:[#allocation7 + $0x364] ss:$24 sps:$4 sm:$0xff]  }
 0x1a1   :  { %1368 = vmatprep.subr.bf16.mxu1 %v3729_v4  ;;  %1649 = vmatprep.subr.bf16.mxu0 %v3732_v10  ;;  %v3822_v59 = vld [vmem:[#allocation7 + $0x36c] ss:$24 sps:$4 sm:$0xff]   ;;  %v3817_v4 = vld [vmem:[#allocation7 + $0x360] ss:$24 sps:$4 sm:$0xff]  }
 0x1a2   :  { %v3820_v10 = vld [vmem:[#allocation7 + $0x368] ss:$24 sps:$4 sm:$0xff]  }
 0x1a4   :  { %1369 = vmatpush1.bf16.msra.mxu1 %v3727_v11  ;;  %1650 = vmatpush1.bf16.msra.mxu0 %v3730_v36  ;;  %v3825_v11 = vld [vmem:[#allocation7 + $0x334] ss:$24 sps:$4 sm:$0xff]  }
 0x1a5   :  { %1370 = vmatprep.subr.bf16.mxu1 %v3735_v22  ;;  %1651 = vmatprep.subr.bf16.mxu0 %v3738_v32  ;;  %v3828_v36 = vld [vmem:[#allocation7 + $0x33c] ss:$24 sps:$4 sm:$0xff]   ;;  %v3823_v22 = vld [vmem:[#allocation7 + $0x330] ss:$24 sps:$4 sm:$0xff]  }
 0x1a6   :  { %v3826_v32 = vld [vmem:[#allocation7 + $0x338] ss:$24 sps:$4 sm:$0xff]  }
 0x1a8   :  { %1371 = vmatpush1.bf16.msra.mxu1 %v3733_v18  ;;  %1652 = vmatpush1.bf16.msra.mxu0 %v3736_v42  ;;  %v3831_v18 = vld [vmem:[#allocation7 + $0x304] ss:$24 sps:$4 sm:$0xff]  }
 0x1a9   :  { %1678 = vmatprep.subr.bf16.mxu1 %v3741_v60  ;;  %1719 = vmatprep.subr.bf16.mxu0 %v3744_v54  ;;  %v3834_v42 = vld [vmem:[#allocation7 + $0x30c] ss:$24 sps:$4 sm:$0xff]   ;;  %v3829_v60 = vld [vmem:[#allocation7 + $0x300] ss:$24 sps:$4 sm:$0xff]  }
 0x1aa   :  { %v3832_v54 = vld [vmem:[#allocation7 + $0x308] ss:$24 sps:$4 sm:$0xff]  }
 0x1ab   :  { %1389 = vmatmul.mubr.bf16.vlgmr.msra.gmra.mxu1 %v4616_v62  ;;  %1670 = vmatmul.mubr.bf16.vlgmr.msra.gmra.mxu0 %v4613_v55  ;;  %v3789_v62 = vld [vmem:[#allocation7 + $0x454] ss:$24 sps:$4 sm:$0xff]  }
 0x1ac   :  { %1679 = vmatpush1.bf16.msra.mxu1 %v3739_v44  ;;  %1720 = vmatpush1.bf16.msra.mxu0 %v3742_v31  ;;  %v3837_v44 = vld [vmem:[#allocation7 + $0x464] ss:$24 sps:$4 sm:$0xff]   ;;  %v3840_v31 = vld [vmem:[#allocation7 + $0x5d4] ss:$24 sps:$4 sm:$0xff]  }
 0x1ad   :  { %1680 = vmatprep.subr.bf16.mxu1 %v3747_v53  ;;  %1721 = vmatprep.subr.bf16.mxu0 %v3750_v23  ;;  %v3835_v53 = vld [vmem:[#allocation7 + $0x460] ss:$24 sps:$4 sm:$0xff]   ;;  %v3838_v23 = vld [vmem:[#allocation7 + $0x5d0] ss:$24 sps:$4 sm:$0xff]  }
 0x1ae   :  { %1710 = vmatprep.mubr.bf16.mxu1 %v4116_v57  ;;  %1751 = vmatprep.mubr.bf16.mxu0 %v4116_v57 }
 0x1b0   :  { %1681 = vmatpush1.bf16.msra.mxu1 %v3745_v51  ;;  %1722 = vmatpush1.bf16.msra.mxu0 %v3748_v35  ;;  %v3843_v51 = vld [vmem:[#allocation7 + $0x434] ss:$24 sps:$4 sm:$0xff]   ;;  %v3846_v35 = vld [vmem:[#allocation7 + $0x5a4] ss:$24 sps:$4 sm:$0xff]  }
 0x1b1   :  { %1682 = vmatprep.subr.bf16.mxu1 %v3753_v33  ;;  %1723 = vmatprep.subr.bf16.mxu0 %v3756_v40  ;;  %v3841_v33 = vld [vmem:[#allocation7 + $0x430] ss:$24 sps:$4 sm:$0xff]   ;;  %v3844_v40 = vld [vmem:[#allocation7 + $0x5a0] ss:$24 sps:$4 sm:$0xff]  }
 0x1b4   :  { %1683 = vmatpush1.bf16.msra.mxu1 %v3751_v43  ;;  %1724 = vmatpush1.bf16.msra.mxu0 %v3754_v17  ;;  %v3849_v43 = vld [vmem:[#allocation7 + $0x404] ss:$24 sps:$4 sm:$0xff]   ;;  %v3852_v17 = vld [vmem:[#allocation7 + $0x574] ss:$24 sps:$4 sm:$0xff]  }
 0x1b5   :  { %1684 = vmatprep.subr.bf16.mxu1 %v3759_v30  ;;  %1725 = vmatprep.subr.bf16.mxu0 %v3762_v56  ;;  %v3847_v30 = vld [vmem:[#allocation7 + $0x400] ss:$24 sps:$4 sm:$0xff]   ;;  %v3850_v56 = vld [vmem:[#allocation7 + $0x570] ss:$24 sps:$4 sm:$0xff]  }
 0x1b8   :  { %1685 = vmatpush1.bf16.msra.mxu1 %v3757_v45  ;;  %1726 = vmatpush1.bf16.msra.mxu0 %v3760_v52  ;;  %v3855_v45 = vld [vmem:[#allocation7 + $0x3d4] ss:$24 sps:$4 sm:$0xff]   ;;  %v3858_v52 = vld [vmem:[#allocation7 + $0x544] ss:$24 sps:$4 sm:$0xff]  }
 0x1b9   :  { %1686 = vmatprep.subr.bf16.mxu1 %v3765_v0  ;;  %1727 = vmatprep.subr.bf16.mxu0 %v3768_v8  ;;  %v3853_v0 = vld [vmem:[#allocation7 + $0x3d0] ss:$24 sps:$4 sm:$0xff]   ;;  %v3856_v8 = vld [vmem:[#allocation7 + $0x540] ss:$24 sps:$4 sm:$0xff]  }
 0x1bc   :  { %1687 = vmatpush1.bf16.msra.mxu1 %v3763_v21  ;;  %1728 = vmatpush1.bf16.msra.mxu0 %v3766_v47  ;;  %v3861_v21 = vld [vmem:[#allocation7 + $0x3a4] ss:$24 sps:$4 sm:$0xff]   ;;  %v3864_v47 = vld [vmem:[#allocation7 + $0x514] ss:$24 sps:$4 sm:$0xff]  }
 0x1bd   :  { %1688 = vmatprep.subr.bf16.mxu1 %v3771_v5  ;;  %1729 = vmatprep.subr.bf16.mxu0 %v3774_v48  ;;  %v3859_v5 = vld [vmem:[#allocation7 + $0x3a0] ss:$24 sps:$4 sm:$0xff]   ;;  %v3862_v48 = vld [vmem:[#allocation7 + $0x510] ss:$24 sps:$4 sm:$0xff]  }
 0x1c0   :  { %1689 = vmatpush1.bf16.msra.mxu1 %v3769_v7  ;;  %1730 = vmatpush1.bf16.msra.mxu0 %v3772_v49  ;;  %v3867_v7 = vld [vmem:[#allocation7 + $0x374] ss:$24 sps:$4 sm:$0xff]   ;;  %v3870_v49 = vld [vmem:[#allocation7 + $0x4e4] ss:$24 sps:$4 sm:$0xff]  }
 0x1c1   :  { %1690 = vmatprep.subr.bf16.mxu1 %v3777_v26  ;;  %1731 = vmatprep.subr.bf16.mxu0 %v3780_v27  ;;  %v3865_v26 = vld [vmem:[#allocation7 + $0x370] ss:$24 sps:$4 sm:$0xff]   ;;  %v3868_v27 = vld [vmem:[#allocation7 + $0x4e0] ss:$24 sps:$4 sm:$0xff]  }
 0x1c4   :  { %1691 = vmatpush1.bf16.msra.mxu1 %v3775_v19  ;;  %1732 = vmatpush1.bf16.msra.mxu0 %v3778_v39  ;;  %v3873_v19 = vld [vmem:[#allocation7 + $0x344] ss:$24 sps:$4 sm:$0xff]   ;;  %v3876_v39 = vld [vmem:[#allocation7 + $0x4b4] ss:$24 sps:$4 sm:$0xff]  }
 0x1c5   :  { %1692 = vmatprep.subr.bf16.mxu1 %v3783_v29  ;;  %1733 = vmatprep.subr.bf16.mxu0 %v3786_v14  ;;  %v3871_v29 = vld [vmem:[#allocation7 + $0x340] ss:$24 sps:$4 sm:$0xff]   ;;  %v3874_v14 = vld [vmem:[#allocation7 + $0x4b0] ss:$24 sps:$4 sm:$0xff]  }
 0x1c8   :  { %1693 = vmatpush1.bf16.msra.mxu1 %v3781_v37  ;;  %1734 = vmatpush1.bf16.msra.mxu0 %v3784_v9  ;;  %v3879_v37 = vld [vmem:[#allocation7 + $0x314] ss:$24 sps:$4 sm:$0xff]   ;;  %v3882_v9 = vld [vmem:[#allocation7 + $0x484] ss:$24 sps:$4 sm:$0xff]  }
 0x1c9   :  { %2000 = vmatprep.subr.bf16.mxu1 %v3789_v62  ;;  %2041 = vmatprep.subr.bf16.mxu0 %v3792_v46  ;;  %v3877_v62 = vld [vmem:[#allocation7 + $0x310] ss:$24 sps:$4 sm:$0xff]   ;;  %v3880_v46 = vld [vmem:[#allocation7 + $0x480] ss:$24 sps:$4 sm:$0xff]  }
 0x1cb   :  { %1711 = vmatmul.mubr.bf16.vlgmr.msra.gmra.mxu1 %v4613_v55  ;;  %1752 = vmatmul.mubr.bf16.vlgmr.msra.gmra.mxu0 %v4613_v55  ;;  %v3810_v55 = vld [vmem:[#allocation7 + $0x3cc] ss:$24 sps:$4 sm:$0xff]  }
 0x1cc   :  { %2001 = vmatpush1.bf16.msra.mxu1 %v3787_v24  ;;  %2042 = vmatpush1.bf16.msra.mxu0 %v3790_v38  ;;  %v3885_v24 = vld [vmem:[#allocation7 + $0x5dc] ss:$24 sps:$4 sm:$0xff]  }
 0x1cd   :  { %2002 = vmatprep.subr.bf16.mxu1 %v3795_v34  ;;  %2043 = vmatprep.subr.bf16.mxu0 %v3798_v63  ;;  %v3888_v38 = vld [vmem:[#allocation7 + $0x5e4] ss:$24 sps:$4 sm:$0xff]   ;;  %v3883_v34 = vld [vmem:[#allocation7 + $0x5d8] ss:$24 sps:$4 sm:$0xff]  }
 0x1ce   :  { %2032 = vmatprep.mubr.bf16.mxu1 %v4116_v57  ;;  %2073 = vmatprep.mubr.bf16.mxu0 %v4116_v57  ;;  %v3886_v63 = vld [vmem:[#allocation7 + $0x5e0] ss:$24 sps:$4 sm:$0xff]  }
 0x1d0   :  { %2003 = vmatpush1.bf16.msra.mxu1 %v3793_v20  ;;  %2044 = vmatpush1.bf16.msra.mxu0 %v3796_v41  ;;  %v4635_v20 = vrot.slane %v4611_v25, 4  ;;  %v3891_v41 = vld [vmem:[#allocation7 + $0x5ac] ss:$24 sps:$4 sm:$0xff]  }
 0x1d1   :  { %2004 = vmatprep.subr.bf16.mxu1 %v3801_v58  ;;  %2045 = vmatprep.subr.bf16.mxu0 %v3804_v61  ;;  %v3894_v58 = vld [vmem:[#allocation7 + $0x5b4] ss:$24 sps:$4 sm:$0xff]   ;;  %v3889_v61 = vld [vmem:[#allocation7 + $0x5a8] ss:$24 sps:$4 sm:$0xff]  }
 0x1d4   :  { %2005 = vmatpush1.bf16.msra.mxu1 %v3799_v16  ;;  %2046 = vmatpush1.bf16.msra.mxu0 %v3802_v13  ;;  %v3892_v16 = vld [vmem:[#allocation7 + $0x5b0] ss:$24 sps:$4 sm:$0xff]   ;;  %v3897_v13 = vld [vmem:[#allocation7 + $0x57c] ss:$24 sps:$4 sm:$0xff]  }
 0x1d5   :  { %2006 = vmatprep.subr.bf16.mxu1 %v3807_v1  ;;  %2047 = vmatprep.subr.bf16.mxu0 %v3810_v55  ;;  %v3900_v1 = vld [vmem:[#allocation7 + $0x584] ss:$24 sps:$4 sm:$0xff]   ;;  %v3895_v55 = vld [vmem:[#allocation7 + $0x578] ss:$24 sps:$4 sm:$0xff]  }
 0x1d8   :  { %2007 = vmatpush1.bf16.msra.mxu1 %v3805_v50  ;;  %2048 = vmatpush1.bf16.msra.mxu0 %v3808_v2  ;;  %v3898_v50 = vld [vmem:[#allocation7 + $0x580] ss:$24 sps:$4 sm:$0xff]   ;;  %v3906_v2 = vld [vmem:[#allocation7 + $0x554] ss:$24 sps:$4 sm:$0xff]  }
 0x1d9   :  { %2008 = vmatprep.subr.bf16.mxu1 %v3813_v3  ;;  %2049 = vmatprep.subr.bf16.mxu0 %v3816_v12  ;;  %v3901_v3 = vld [vmem:[#allocation7 + $0x548] ss:$24 sps:$4 sm:$0xff]  }
 0x1da   :  { %v3904_v12 = vld [vmem:[#allocation7 + $0x550] ss:$24 sps:$4 sm:$0xff]  }
 0x1dc   :  { %2009 = vmatpush1.bf16.msra.mxu1 %v3811_v15  ;;  %2050 = vmatpush1.bf16.msra.mxu0 %v3814_v6  ;;  %v3909_v15 = vld [vmem:[#allocation7 + $0x51c] ss:$24 sps:$4 sm:$0xff]  }
 0x1dd   :  { %2010 = vmatprep.subr.bf16.mxu1 %v3819_v28  ;;  %2051 = vmatprep.subr.bf16.mxu0 %v3822_v59  ;;  %v3912_v6 = vld [vmem:[#allocation7 + $0x524] ss:$24 sps:$4 sm:$0xff]   ;;  %v3907_v28 = vld [vmem:[#allocation7 + $0x518] ss:$24 sps:$4 sm:$0xff]  }
 0x1de   :  { %v3915_v59 = vld [vmem:[#allocation7 + $0x4ec] ss:$24 sps:$4 sm:$0xff]  }
 0x1e0   :  { %2011 = vmatpush1.bf16.msra.mxu1 %v3817_v4  ;;  %2052 = vmatpush1.bf16.msra.mxu0 %v3820_v10  ;;  %v3918_v4 = vld [vmem:[#allocation7 + $0x4f4] ss:$24 sps:$4 sm:$0xff]   ;;  %v3913_v10 = vld [vmem:[#allocation7 + $0x4e8] ss:$24 sps:$4 sm:$0xff]  }
 0x1e1   :  { %2012 = vmatprep.subr.bf16.mxu1 %v3825_v11  ;;  %2053 = vmatprep.subr.bf16.mxu0 %v3828_v36  ;;  %v3916_v11 = vld [vmem:[#allocation7 + $0x4f0] ss:$24 sps:$4 sm:$0xff]   ;;  %v3921_v36 = vld [vmem:[#allocation7 + $0x4bc] ss:$24 sps:$4 sm:$0xff]  }
 0x1e4   :  { %2013 = vmatpush1.bf16.msra.mxu1 %v3823_v22  ;;  %2054 = vmatpush1.bf16.msra.mxu0 %v3826_v32  ;;  %v3924_v22 = vld [vmem:[#allocation7 + $0x4c4] ss:$24 sps:$4 sm:$0xff]   ;;  %v3919_v32 = vld [vmem:[#allocation7 + $0x4b8] ss:$24 sps:$4 sm:$0xff]  }
 0x1e5   :  { %2014 = vmatprep.subr.bf16.mxu1 %v3831_v18  ;;  %2055 = vmatprep.subr.bf16.mxu0 %v3834_v42  ;;  %v3922_v18 = vld [vmem:[#allocation7 + $0x4c0] ss:$24 sps:$4 sm:$0xff]   ;;  %v3927_v42 = vld [vmem:[#allocation7 + $0x48c] ss:$24 sps:$4 sm:$0xff]  }
 0x1e8   :  { %2015 = vmatpush1.bf16.msra.mxu1 %v3829_v60  ;;  %2056 = vmatpush1.bf16.msra.mxu0 %v3832_v54  ;;  %v3930_v60 = vld [vmem:[#allocation7 + $0x494] ss:$24 sps:$4 sm:$0xff]   ;;  %v3925_v54 = vld [vmem:[#allocation7 + $0x488] ss:$24 sps:$4 sm:$0xff]  }
 0x1e9   :  { %2082 = vmatprep.subr.bf16.mxu1 %v3837_v44  ;;  %2372 = vmatprep.subr.bf16.mxu0 %v3840_v31  ;;  %v3928_v44 = vld [vmem:[#allocation7 + $0x490] ss:$24 sps:$4 sm:$0xff]   ;;  %v3931_v31 = vld [vmem:[#allocation10 + $0x78] sm:$0xff]  }
 0x1eb   :  { %2033 = vmatmul.mubr.bf16.vlgmr.msra.gmra.mxu1 %v4611_v25  ;;  %2074 = vmatmul.mubr.bf16.vlgmr.msra.gmra.mxu0 %v4611_v25 }
 0x1ec   :  { %2083 = vmatpush1.bf16.msra.mxu1 %v3835_v53  ;;  %2373 = vmatpush1.bf16.msra.mxu0 %v3838_v23  ;;  %v3932_v53 = vld [vmem:[#allocation10 + $0x38] sm:$0xff]   ;;  %v3933_v23 = vld [vmem:[#allocation10 + $0x70] sm:$0xff]  }
 0x1ed   :  { %2084 = vmatprep.subr.bf16.mxu1 %v3843_v51  ;;  %2374 = vmatprep.subr.bf16.mxu0 %v3846_v35  ;;  %v3934_v51 = vld [vmem:[#allocation10 + $0x30] sm:$0xff]   ;;  %v3935_v35 = vld [vmem:[#allocation10 + $0x68] sm:$0xff]  }
 0x1ee   :  { %2114 = vmatprep.mubr.bf16.mxu1 %v4116_v57  ;;  %2404 = vmatprep.mubr.bf16.mxu0 %v4116_v57 }
 0x1f0   :  { %2085 = vmatpush1.bf16.msra.mxu1 %v3841_v33  ;;  %2375 = vmatpush1.bf16.msra.mxu0 %v3844_v40  ;;  %v3936_v33 = vld [vmem:[#allocation10 + $0x28] sm:$0xff]   ;;  %v3937_v40 = vld [vmem:[#allocation10 + $0x60] sm:$0xff]  }
 0x1f1   :  { %2086 = vmatprep.subr.bf16.mxu1 %v3849_v43  ;;  %2376 = vmatprep.subr.bf16.mxu0 %v3852_v17  ;;  %v3938_v43 = vld [vmem:[#allocation10 + $0x20] sm:$0xff]   ;;  %v3939_v17 = vld [vmem:[#allocation10 + $0x58] sm:$0xff]  }
 0x1f4   :  { %2087 = vmatpush1.bf16.msra.mxu1 %v3847_v30  ;;  %2377 = vmatpush1.bf16.msra.mxu0 %v3850_v56  ;;  %v3940_v30 = vld [vmem:[#allocation10 + $0x18] sm:$0xff]  }
 0x1f5   :  { %2088 = vmatprep.subr.bf16.mxu1 %v3855_v45  ;;  %2378 = vmatprep.subr.bf16.mxu0 %v3858_v52  ;;  %v3941_v52 = vld [vmem:[#allocation10 + $0x50] sm:$0xff]  }
 0x1f8   :  { %2089 = vmatpush1.bf16.msra.mxu1 %v3853_v0  ;;  %2379 = vmatpush1.bf16.msra.mxu0 %v3856_v8  ;;  %v3942_v0 = vld [vmem:[#allocation10 + $0x10] sm:$0xff]  }
 0x1f9   :  { %2090 = vmatprep.subr.bf16.mxu1 %v3861_v21  ;;  %2380 = vmatprep.subr.bf16.mxu0 %v3864_v47 }
 0x1fc   :  { %2091 = vmatpush1.bf16.msra.mxu1 %v3859_v5  ;;  %2381 = vmatpush1.bf16.msra.mxu0 %v3862_v48  ;;  %v3943_v48 = vld [vmem:[#allocation10 + $0x48] sm:$0xff]  }
 0x1fd   :  { %2092 = vmatprep.subr.bf16.mxu1 %v3867_v7  ;;  %2382 = vmatprep.subr.bf16.mxu0 %v3870_v49  ;;  %v3944_v7 = vld [vmem:[#allocation10 + $0x8] sm:$0xff]  }
 0x200   :  { %2093 = vmatpush1.bf16.msra.mxu1 %v3865_v26  ;;  %2383 = vmatpush1.bf16.msra.mxu0 %v3868_v27  ;;  %v3945_v27 = vld [vmem:[#allocation10 + $0x40] sm:$0xff]  }
 0x201   :  { %2094 = vmatprep.subr.bf16.mxu1 %v3873_v19  ;;  %2384 = vmatprep.subr.bf16.mxu0 %v3876_v39  ;;  %v3946_v19 = vld [vmem:[#allocation10] sm:$0xff]   ;;  %v3947_v39 = vld [vmem:[#allocation10 + $0xf8] sm:$0xff]  }
 0x204   :  { %2095 = vmatpush1.bf16.msra.mxu1 %v3871_v29  ;;  %2385 = vmatpush1.bf16.msra.mxu0 %v3874_v14  ;;  %v3948_v29 = vld [vmem:[#allocation10 + $0x178] sm:$0xff]  }
 0x205   :  { %2096 = vmatprep.subr.bf16.mxu1 %v3879_v37  ;;  %2386 = vmatprep.subr.bf16.mxu0 %v3882_v9  ;;  %v3949_v14 = vld [vmem:[#allocation10 + $0xb8] sm:$0xff]   ;;  %v3951_v37 = vld [vmem:[#allocation10 + $0xf0] sm:$0xff]  }
 0x206   :  { %v3953_v9 = vld [vmem:[#allocation10 + $0xb0] sm:$0xff]  }
 0x208   :  { %2097 = vmatpush1.bf16.msra.mxu1 %v3877_v62  ;;  %2387 = vmatpush1.bf16.msra.mxu0 %v3880_v46  ;;  %v3955_v62 = vld [vmem:[#allocation10 + $0xe8] sm:$0xff]  }
 0x209   :  { %2413 = vmatprep.subr.bf16.mxu1 %v3885_v24  ;;  %2454 = vmatprep.subr.bf16.mxu0 %v3888_v38  ;;  %v3957_v46 = vld [vmem:[#allocation10 + $0xa8] sm:$0xff]   ;;  %v3959_v24 = vld [vmem:[#allocation10 + $0xe0] sm:$0xff]  }
 0x20a   :  { %v3961_v38 = vld [vmem:[#allocation10 + $0xa0] sm:$0xff]  }
 0x20b   :  { %2115 = vmatmul.mubr.bf16.vlgmr.msra.gmra.mxu1 %v4611_v25  ;;  %2405 = vmatmul.mubr.bf16.vlgmr.msra.gmra.mxu0 %v4635_v20  ;;  %v3903_v25 = vld [vmem:[#allocation7 + $0x54c] ss:$24 sps:$4 sm:$0xff]  }
 0x20c   :  { %2414 = vmatpush1.bf16.msra.mxu1 %v3883_v34  ;;  %2455 = vmatpush1.bf16.msra.mxu0 %v3886_v63  ;;  %v3963_v34 = vld [vmem:[#allocation10 + $0xd8] sm:$0xff]  }
 0x20d   :  { %2415 = vmatprep.subr.bf16.mxu1 %v3891_v41  ;;  %2456 = vmatprep.subr.bf16.mxu0 %v3894_v58  ;;  %v3965_v63 = vld [vmem:[#allocation10 + $0x98] sm:$0xff]   ;;  %v3967_v58 = vld [vmem:[#allocation10 + $0xd0] sm:$0xff]  }
 0x20e   :  { %2445 = vmatprep.mubr.bf16.mxu1 %v4116_v57  ;;  %2486 = vmatprep.mubr.bf16.mxu0 %v4116_v57  ;;  %v3910_v57 = vld [vmem:[#allocation7 + $0x520] ss:$24 sps:$4 sm:$0xff]  }
 0x210   :  { %2416 = vmatpush1.bf16.msra.mxu1 %v3889_v61  ;;  %2457 = vmatpush1.bf16.msra.mxu0 %v3892_v16  ;;  %v3969_v16 = vld [vmem:[#allocation10 + $0x90] sm:$0xff]  }
 0x211   :  { %2417 = vmatprep.subr.bf16.mxu1 %v3897_v13  ;;  %2458 = vmatprep.subr.bf16.mxu0 %v3900_v1 }
 0x214   :  { %2418 = vmatpush1.bf16.msra.mxu1 %v3895_v55  ;;  %2459 = vmatpush1.bf16.msra.mxu0 %v3898_v50 }
 0x215   :  { %2419 = vmatprep.subr.bf16.mxu1 %v3903_v25  ;;  %2460 = vmatprep.subr.bf16.mxu0 %v3906_v2  ;;  %v3971_v2 = vld [vmem:[#allocation10 + $0xc8] sm:$0xff]  }
 0x218   :  { %2420 = vmatpush1.bf16.msra.mxu1 %v3901_v3  ;;  %2461 = vmatpush1.bf16.msra.mxu0 %v3904_v12  ;;  %v3973_v3 = vld [vmem:[#allocation10 + $0x88] sm:$0xff]  }
 0x219   :  { %2421 = vmatprep.subr.bf16.mxu1 %v3909_v15  ;;  %2462 = vmatprep.subr.bf16.mxu0 %v3912_v6  ;;  %v3975_v6 = vld [vmem:[#allocation10 + $0xc0] sm:$0xff]  }
 0x21c   :  { %2422 = vmatpush1.bf16.msra.mxu1 %v3907_v28  ;;  %2463 = vmatpush1.bf16.msra.mxu0 %v3910_v57  ;;  %v3977_v28 = vld [vmem:[#allocation10 + $0x80] sm:$0xff]  }
 0x21d   :  { %2423 = vmatprep.subr.bf16.mxu1 %v3915_v59  ;;  %2464 = vmatprep.subr.bf16.mxu0 %v3918_v4 }
 0x220   :  { %2424 = vmatpush1.bf16.msra.mxu1 %v3913_v10  ;;  %2465 = vmatpush1.bf16.msra.mxu0 %v3916_v11 }
 0x221   :  { %2425 = vmatprep.subr.bf16.mxu1 %v3921_v36  ;;  %2466 = vmatprep.subr.bf16.mxu0 %v3924_v22 }
 0x224   :  { %2426 = vmatpush1.bf16.msra.mxu1 %v3919_v32  ;;  %2467 = vmatpush1.bf16.msra.mxu0 %v3922_v18 }
 0x225   :  { %2427 = vmatprep.subr.bf16.mxu1 %v3927_v42  ;;  %2468 = vmatprep.subr.bf16.mxu0 %v3930_v60 }
 0x228   :  { %2428 = vmatpush1.bf16.msra.mxu1 %v3925_v54  ;;  %2469 = vmatpush1.bf16.msra.mxu0 %v3928_v44 }
 0x229   :  { %3538 = vmatprep.subr.bf16.mxu1 %v3931_v31  ;;  %3560 = vmatprep.subr.bf16.mxu0 %v3947_v39 }
 0x22b   :  { %2446 = vmatmul.mubr.bf16.vlgmr.msra.gmra.mxu1 %v4635_v20  ;;  %2487 = vmatmul.mubr.bf16.vlgmr.msra.gmra.mxu0 %v4635_v20 }
 0x22c   :  { %3539 = vmatpush3.bf16.msra.mxu1 %v3932_v53  ;;  %3561 = vmatpush3.bf16.msra.mxu0 %v3949_v14 }
 0x22d   :  { %3540 = vmatprep.subr.bf16.mxu1 %v3933_v23  ;;  %3562 = vmatprep.subr.bf16.mxu0 %v3951_v37 }
 0x230   :  { %3541 = vmatpush3.bf16.msra.mxu1 %v3934_v51  ;;  %3563 = vmatpush3.bf16.msra.mxu0 %v3953_v9 }
 0x231   :  { %3542 = vmatprep.subr.bf16.mxu1 %v3935_v35  ;;  %3564 = vmatprep.subr.bf16.mxu0 %v3955_v62 }
 0x234   :  { %3543 = vmatpush3.bf16.msra.mxu1 %v3936_v33  ;;  %3565 = vmatpush3.bf16.msra.mxu0 %v3957_v46 }
 0x235   :  { %3544 = vmatprep.subr.bf16.mxu1 %v3937_v40  ;;  %3566 = vmatprep.subr.bf16.mxu0 %v3959_v24 }
 0x238   :  { %3545 = vmatpush3.bf16.msra.mxu1 %v3938_v43  ;;  %3567 = vmatpush3.bf16.msra.mxu0 %v3961_v38 }
 0x239   :  { %3546 = vmatprep.subr.bf16.mxu1 %v3939_v17  ;;  %3568 = vmatprep.subr.bf16.mxu0 %v3963_v34  ;;  %v2503_v17 = vlaneseq }
 0x23c   :  { %3547 = vmatpush3.bf16.msra.mxu1 %v3940_v30  ;;  %3569 = vmatpush3.bf16.msra.mxu0 %v3965_v63  ;;  %v4659_v30 = vshrl.u32 %v2503_v17, 7 }
 0x23d   :  { %3548 = vmatprep.subr.bf16.mxu1 %v3941_v52  ;;  %3570 = vmatprep.subr.bf16.mxu0 %v3967_v58  ;;  %v3950_v58 = vld [vmem:[#allocation10 + $0x138] sm:$0xff]  }
 0x23e   :  { %v2509_v52 = vsub.s32 1, %v4659_v30 }
 0x240   :  { %3549 = vmatpush3.bf16.msra.mxu1 %v3942_v0  ;;  %3571 = vmatpush3.bf16.msra.mxu0 %v3969_v16  ;;  %v4666_v0 = vld [vmem:[#allocation8] sm:$0x3f]  ;;  %v3952_v16 = vld [vmem:[#allocation10 + $0x170] sm:$0xff]  }
 0x241   :  { %3550 = vmatprep.subr.bf16.mxu1 %v3943_v48  ;;  %3572 = vmatprep.subr.bf16.mxu0 %v3971_v2  ;;  %v2548_v14 = vrot.slane %v4666_v0, %v2509_v52  ;;  %v3964_v2 = vld [vmem:[#allocation10 + $0x158] sm:$0xff]  }
 0x244   :  { %3551 = vmatpush3.bf16.msra.mxu1 %v3944_v7  ;;  %3573 = vmatpush3.bf16.msra.mxu0 %v3973_v3  ;;  %v3966_v3 = vld [vmem:[#allocation10 + $0x118] sm:$0xff]  }
 0x245   :  { %3552 = vmatprep.subr.bf16.mxu1 %v3945_v27  ;;  %3574 = vmatprep.subr.bf16.mxu0 %v3975_v6  ;;  %v2517_v6 = vsub.s32 3, %v4659_v30 }
 0x247   :  { %v2556_v17 = vrot.slane %v4666_v0, %v2517_v6 }
 0x248   :  { %3553 = vmatpush3.bf16.msra.mxu1 %v3946_v19  ;;  %3575 = vmatpush3.bf16.msra.mxu0 %v3977_v28  ;;  %v2525_v28 = vsub.s32 5, %v4659_v30 }
 0x249   :  { %3582 = vmatprep.subr.bf16.mxu1 %v3948_v29 }
 0x24b   :  { %v1308_v56 = vpop.f32.mrf.mxu1  ;;  %v4643_v45 = vpop.f32.mrf.mxu0 }
 0x24d   :  { %v1310_v8 = vpop.f32.mrf.mxu1  ;;  %v4645_v21 = vpop.f32.mrf.mxu0 }
 0x24f   :  { %v1312_v47 = vpop.f32.mrf.mxu1  ;;  %v1353_v5 = vpop.f32.mrf.mxu0 }
 0x251   :  { %v1313_v49 = vpop.f32.mrf.mxu1  ;;  %v1354_v26 = vpop.f32.mrf.mxu0 }
 0x26b   :  { %v1390_v20 = vpop.f32.mrf.mxu1  ;;  %v1671_v41 = vpop.f32.mrf.mxu0 }
 0x26c   :  { %v1672_v61 = vadd.f32 %v1671_v41, %v1308_v56  ;;  %v2505_v56 = vsub.s32 0, %v4659_v30 }
 0x26d   :  { %v1392_v13 = vpop.f32.mrf.mxu1  ;;  %v1673_v1 = vpop.f32.mrf.mxu0 }
 0x26e   :  { %v1674_v55 = vadd.f32 %v1673_v1, %v1310_v8  ;;  %v2544_v49 = vrot.slane %v4666_v0, %v2505_v56  ;;  %v3956_v1 = vld [vmem:[#allocation10 + $0x168] sm:$0xff]  }
 0x26f   :  { %v1394_v50 = vpop.f32.mrf.mxu1  ;;  %v1675_v25 = vpop.f32.mrf.mxu0 }
 0x270   :  { %v3960_v50 = vld [vmem:[#allocation10 + $0x160] sm:$0xff]  }
 0x271   :  { %v1395_v12 = vpop.f32.mrf.mxu1  ;;  %v1676_v15 = vpop.f32.mrf.mxu0  ;;  %v3962_v25 = vld [vmem:[#allocation10 + $0x120] sm:$0xff]  }
 0x272   :  { %v2513_v12 = vsub.s32 2, %v4659_v30  ;;  %v2521_v15 = vsub.s32 4, %v4659_v30 }
 0x28b   :  { %v1712_v57 = vpop.f32.mrf.mxu1  ;;  %v1753_v59 = vpop.f32.mrf.mxu0 }
 0x28c   :  { %v1713_v4 = vadd.f32 %v1712_v57, %v4643_v45  ;;  %v4648_v10 = vadd.f32 %v1753_v59, %v1390_v20  ;;  %v2501_v45 = vld [vmem:[%s4694_s5] sm:$0x3f]  ;;  %v3968_v57 = vld [vmem:[#allocation10 + $0x150] sm:$0xff]  }
 0x28d   :  { %v1714_v11 = vpop.f32.mrf.mxu1  ;;  %v1755_v36 = vpop.f32.mrf.mxu0  ;;  %v2510_v26 = vrot.slane %v2501_v45, %v2509_v52 }
 0x28e   :  { %v4651_v22 = vadd.f32 %v1714_v11, %v4645_v21  ;;  %v4653_v32 = vadd.f32 %v1755_v36, %v1392_v13  ;;  %v2506_v21 = vrot.slane %v2501_v45, %v2505_v56  ;;  %v3954_v13 = vld [vmem:[#allocation10 + $0x130] sm:$0xff]   ;;  %v2522_v11 = vrot.slane %v2501_v45, %v2521_v15 }
 0x28f   :  { %v1716_v18 = vpop.f32.mrf.mxu1  ;;  %v1757_v42 = vpop.f32.mrf.mxu0  ;;  %v3970_v36 = vld [vmem:[#allocation10 + $0x110] sm:$0xff]   ;;  %v2564_v56 = vrot.slane %v4666_v0, %v2525_v28 }
 0x290   :  { %v2552_v42 = vrot.slane %v4666_v0, %v2513_v12 }
 0x291   :  { %v1717_v60 = vpop.f32.mrf.mxu1  ;;  %v1758_v54 = vpop.f32.mrf.mxu0 }
 0x292   :  { %v2560_v54 = vrot.slane %v4666_v0, %v2521_v15  ;;  %v3978_v0 = vld [vmem:[#allocation10 + $0x100] sm:$0xff]  }
 0x2ab   :  { %v2034_v44 = vpop.f32.mrf.mxu1  ;;  %v2075_v31 = vpop.f32.mrf.mxu0 }
 0x2ac   :  { %v4655_v53 = vadd.f32 %v2075_v31, %v1713_v4  ;;  %v2123_v8 = vadd.f32 %v2034_v44, %v1672_v61  ;;  %v2514_v4 = vrot.slane %v2501_v45, %v2513_v12  ;;  %v2518_v44 = vrot.slane %v2501_v45, %v2517_v6 }
 0x2ad   :  { %v2036_v23 = vpop.f32.mrf.mxu1  ;;  %v4657_v51 = vpop.f32.mrf.mxu0  ;;  %v2526_v31 = vrot.slane %v2501_v45, %v2525_v28 }
 0x2ae   :  { %v2124_v48 = vadd.f32 %v2036_v23, %v1674_v55  ;;  %v3958_v55 = vld [vmem:[#allocation10 + $0x128] sm:$0xff]  }
 0x2af   :  { %v2038_v35 = vpop.f32.mrf.mxu1  ;;  %v2079_v33 = vpop.f32.mrf.mxu0  ;;  %v3972_v23 = vld [vmem:[#allocation10 + $0x148] sm:$0xff]  }
 0x2b0   :  { %v2126_v35 = vadd.f32 %v4657_v51, %v4651_v22  ;;  %v3976_v22 = vld [vmem:[#allocation10 + $0x140] sm:$0xff]  }
 0x2b1   :  { %v2039_v40 = vpop.f32.mrf.mxu1  ;;  %v2080_v43 = vpop.f32.mrf.mxu0 }
 0x2cb   :  { %v2116_v47 = vpop.f32.mrf.mxu1  ;;  %v2406_v5 = vpop.f32.mrf.mxu0 }
 0x2cc   :  { %v2495_v7 = vadd.f32 %v2406_v5, %v2123_v8  ;;  %v2127_v59 = vadd.f32 %v2116_v47, %v4648_v10  ;;  %v3974_v47 = vld [vmem:[#allocation10 + $0x108] sm:$0xff]  }
 0x2cd   :  { %v2118_v27 = vpop.f32.mrf.mxu1  ;;  %v2408_v19 = vpop.f32.mrf.mxu0 }
 0x2ce   :  { %v2533_v39 = vmul.f32 %v2506_v21, %v2495_v7  ;;  %v2496_v29 = vadd.f32 %v2408_v19, %v2124_v48  ;;  %v2128_v33 = vadd.f32 %v2118_v27, %v4653_v32 }
 0x2cf   :  { %v2120_v37 = vpop.f32.mrf.mxu1  ;;  %v2410_v9 = vpop.f32.mrf.mxu0 }
 0x2d0   :  { %v2571_v62 = vadd.f32 %v2544_v49, %v2533_v39  ;;  %v2534_v46 = vmul.f32 %v2510_v26, %v2496_v29 }
 0x2d1   :  { %v2121_v24 = vpop.f32.mrf.mxu1  ;;  %v2411_v38 = vpop.f32.mrf.mxu0 }
 0x2d2   :  { %v2572_v34 = vadd.f32 %v2548_v14, %v2534_v46  ;;  %v2577_v63 = vmax.f32 %v2571_v62, 0.0 }
 0x2d4   :  { %v2578_v20 = vmax.f32 %v2572_v34, 0.0  ;;  %v2583_v61 = vpack.c.bf16 %v2577_v63, %v2577_v63 }
 0x2d6   :  { %v2584_v41 = vpack.c.bf16 %v2578_v20, %v2578_v20 }
 0x2d8   :  { %3012 = vmatprep.mubr.bf16.mxu1 %v2584_v41 }
 0x2d9   :  { %3013 = vmatmul.mubr.bf16.vlgmr.msra.gmra.mxu1 %v2583_v61 }
 0x2da   :  { %3583 = vmatpush3.bf16.msra.mxu1 %v3950_v58  ;;  %v3320_v58 = vld [vmem:[%s4697_s8] ss:$0 sm:$0xff] }
 0x2db   :  { %3584 = vmatprep.subr.bf16.mxu1 %v3952_v16 }
 0x2de   :  { %3585 = vmatpush3.bf16.msra.mxu1 %v3954_v13 }
 0x2df   :  { %3586 = vmatprep.subr.bf16.mxu1 %v3956_v1 }
 0x2e2   :  { %3587 = vmatpush3.bf16.msra.mxu1 %v3958_v55 }
 0x2e3   :  { %3588 = vmatprep.subr.bf16.mxu1 %v3960_v50 }
 0x2e6   :  { %3589 = vmatpush3.bf16.msra.mxu1 %v3962_v25 }
 0x2e7   :  { %3590 = vmatprep.subr.bf16.mxu1 %v3964_v2 }
 0x2ea   :  { %3591 = vmatpush3.bf16.msra.mxu1 %v3966_v3 }
 0x2eb   :  { %v2447_v18 = vpop.f32.mrf.mxu1  ;;  %v2488_v60 = vpop.f32.mrf.mxu0  ;;  %3592 = vmatprep.subr.bf16.mxu1 %v3968_v57 }
 0x2ec   :  { %v2497_v10 = vadd.f32 %v2447_v18, %v4655_v53  ;;  %v2499_v40 = vadd.f32 %v2488_v60, %v2127_v59 }
 0x2ed   :  { %v2449_v43 = vpop.f32.mrf.mxu1  ;;  %v2490_v30 = vpop.f32.mrf.mxu0 }
 0x2ee   :  { %v2535_v52 = vmul.f32 %v2514_v4, %v2497_v10  ;;  %v2537_v8 = vmul.f32 %v2522_v11, %v2499_v40  ;;  %v2498_v21 = vadd.f32 %v2449_v43, %v2126_v35  ;;  %v2500_v45 = vadd.f32 %v2490_v30, %v2128_v33  ;;  %3593 = vmatpush3.bf16.msra.mxu1 %v3970_v36 }
 0x2ef   :  { %v2451_v5 = vpop.f32.mrf.mxu1  ;;  %v2492_v48 = vpop.f32.mrf.mxu0  ;;  %3594 = vmatprep.subr.bf16.mxu1 %v3972_v23 }
 0x2f0   :  { %v2573_v32 = vadd.f32 %v2552_v42, %v2535_v52  ;;  %v2575_v51 = vadd.f32 %v2560_v54, %v2537_v8  ;;  %v2536_v53 = vmul.f32 %v2518_v44, %v2498_v21  ;;  %v2538_v7 = vmul.f32 %v2526_v31, %v2500_v45 }
 0x2f1   :  { %v2452_v49 = vpop.f32.mrf.mxu1  ;;  %v2493_v26 = vpop.f32.mrf.mxu0 }
 0x2f2   :  { %v2574_v27 = vadd.f32 %v2556_v17, %v2536_v53  ;;  %v2576_v19 = vadd.f32 %v2564_v56, %v2538_v7  ;;  %3595 = vmatpush3.bf16.msra.mxu1 %v3974_v47  ;;  %v2579_v39 = vmax.f32 %v2573_v32, 0.0  ;;  %v2581_v29 = vmax.f32 %v2575_v51, 0.0 }
 0x2f3   :  { %3596 = vmatprep.subr.bf16.mxu1 %v3976_v22 }
 0x2f4   :  { %v2580_v14 = vmax.f32 %v2574_v27, 0.0  ;;  %v2582_v37 = vmax.f32 %v2576_v19, 0.0  ;;  %v2585_v46 = vpack.c.bf16 %v2579_v39, %v2579_v39  ;;  %v2587_v24 = vpack.c.bf16 %v2581_v29, %v2581_v29 }
 0x2f6   :  { %3597 = vmatpush3.bf16.msra.mxu1 %v3978_v0  ;;  %v2586_v9 = vpack.c.bf16 %v2580_v14, %v2580_v14  ;;  %v2588_v62 = vpack.c.bf16 %v2582_v37, %v2582_v37 }
 0x2f8   :  { %3052 = vmatprep.mubr.bf16.mxu0 %v2586_v9  ;;  %3092 = vmatprep.mubr.bf16.mxu1 %v2588_v62 }
 0x2f9   :  { %3053 = vmatmul.mubr.bf16.vlgmr.msra.gmra.mxu0 %v2585_v46  ;;  %3093 = vmatmul.mubr.bf16.vlgmr.msra.gmra.mxu1 %v2587_v24 }
 0x399   :  { %v3554_v38 = vpop.f32.mrf.mxu1 }
 0x39b   :  { %v3555_v34 = vpop.f32.mrf.mxu1 }
 0x39c   :  { %v3556_v41 = vadd.f32 %v3555_v34, %v3554_v38 }
 0x39d   :  { %v3557_v63 = vpop.f32.mrf.mxu1 }
 0x39e   :  { %v3015_v55 = vadd.f32 %v3556_v41, %v3320_v58 }
 0x39f   :  { %v3558_v20 = vpop.f32.mrf.mxu1 }
 0x3b9   :  { %v3576_v61 = vpop.f32.mrf.mxu0  ;;  %v3598_v16 = vpop.f32.mrf.mxu1 }
 0x3bb   :  { %v3577_v13 = vpop.f32.mrf.mxu0  ;;  %v3599_v1 = vpop.f32.mrf.mxu1 }
 0x3bc   :  { %v3578_v50 = vadd.f32 %v3577_v13, %v3576_v61  ;;  %v3600_v12 = vadd.f32 %v3599_v1, %v3598_v16 }
 0x3bd   :  { %v3579_v25 = vpop.f32.mrf.mxu0  ;;  %v3601_v2 = vpop.f32.mrf.mxu1 }
 0x3be   :  { %v3055_v3 = vadd.f32 %v3578_v50, %v3015_v55 }
 0x3bf   :  { %v3580_v15 = vpop.f32.mrf.mxu0  ;;  %v3602_v6 = vpop.f32.mrf.mxu1 }
 0x3c0   :  { %v3095_v28 = vadd.f32 %v3600_v12, %v3055_v3 }
 0x3c2   :  { %3100 = vst [vmem:[#allocation11] sm:$0xff] %v3095_v28 }
 0x3c3   :  { %4090 = shalt.err (!%p4087_p1)
}
 0x3c4   :  { %3110 = dma.vmem_to_hbm [thread:$0]  %s3108_s18, 128, %s4698_s9, [#allocation4]  }
 0x3c5   :  { %4105 = dma.done.wait [#allocation4], 128  }
 0x3c6   :  { %4106 = vsyncadd [#allocation4], 4294967168 }
 0x3c7   :  { %3114 = vsyncpa [#allocation3], 1 }
 0x3c8   :  { %3115 = vsyncpa [#allocation6], 1 }
 0x3c9   :  { %3116 = vsyncpa [#allocation9], 1 }
 0x3ca   :  { %3117 = vsyncpa [#allocation4], 1 }

</bundles_post_ra>
